<compile_context>
chip_gen: v7x
topology: tpu7x:2x2x1
jax: 0.10.0
libtpu: 0.0.40
codegen_flags: <defaults>
</compile_context>

<pallas_src>
import jax
import jax.numpy as jnp
from jax import lax
from jax.experimental import pallas as pl
from jax.experimental.pallas import tpu as pltpu


def _shift_lanes(a, k):
    """roll(a, -k) along the lane axis via slicing (wrap lands in garbage lanes)."""
    if k == 0:
        return a
    return jnp.concatenate([a[:, k:], a[:, :k]], axis=1)


# -----------------------------------------------------------------------------
# Pallas kernel: whole forward pass, whole batch, gridless (everything in VMEM).
# -----------------------------------------------------------------------------
def cltfp_kernel(x_conv_ref, x_tm_ref,
                 w1_ref, b1_ref, w2_ref, b2_ref, w3_ref, b3_ref,
                 wih_t_ref, whh_t_ref, lstm_b_ref,
                 l2w_ref, l2w_sm_ref, l1wh_ref, wbd_ref, head_b_ref,
                 out_ref):
    f32 = jnp.float32
    T = x_conv_ref.shape[0]                 # in_timesteps (= conv channels in)
    TB, N = x_tm_ref.shape                  # T*B, num_nodes
    B = TB // T
    H = whh_t_ref.shape[0]                  # lstm hidden
    out_T = l2w_ref.shape[0]
    LANES = x_conv_ref.shape[1]             # B*N  (flat slab width)

    # --- CNN branch: flat slab layout, lanes = b*N + l; one dot per layer -----
    def conv_relu(inp, w_ref, b_ref):
        # inp: (C_in, B*N); w_ref: (C_out, K*C_in) k-major; b_ref: (C_out, 1)
        c_in = inp.shape[0]
        k_sz = w_ref.shape[1] // c_in
        pieces = [inp] + [_shift_lanes(inp, k) for k in range(1, k_sz)]
        slab = jnp.concatenate(pieces, axis=0)            # (K*C_in, B*N)
        out = jnp.dot(w_ref[...], slab, preferred_element_type=f32)
        return jnp.maximum(out + b_ref[...], 0.0)         # (C_out, B*N)

    c1 = conv_relu(x_conv_ref[...], w1_ref, b1_ref)       # (C, B*N)
    c2 = conv_relu(c1, w2_ref, b2_ref)                    # (C, B*N)
    c3 = conv_relu(c2, w3_ref, b3_ref)                    # (T, B*N); valid l < Lc

    # --- LSTM branch (PyTorch gate order i, f, g, o), time-major xw -----------
    xw = (jnp.dot(x_tm_ref[...], wih_t_ref[...], preferred_element_type=f32)
          + lstm_b_ref[...])                              # (T*B, 4H)
    xw3 = xw.reshape(T, B, 4 * H)                         # free leading split

    whh_t = whh_t_ref[...]                                # (H, 4H)
    h = jnp.zeros((B, H), f32)
    c = jnp.zeros((B, H), f32)
    acc = [jnp.zeros((B, H), f32) for _ in range(out_T)]  # l2-folded accumulators

    # TODO(synk): per-chip option — keep W_hh latched in the MXU
    # (pltpu.matmul_push_rhs / matmul_acc_lhs) on v5e, or move h@W_hh to the
    # VPU / MRB-accumulate on v6e/v7x; kept as a plain dot for portability.
    for t in range(T):                                    # static unroll (T small)
        gates = xw3[t] + jnp.dot(h, whh_t, preferred_element_type=f32)  # (B, 4H)
        sig = jax.nn.sigmoid(gates)                       # one EUP pass (i,f,o + g)
        g_g = jnp.tanh(gates[:, 2 * H:3 * H])             # tanh only on g slice
        i_g = sig[:, 0:H]
        f_g = sig[:, H:2 * H]
        o_g = sig[:, 3 * H:4 * H]
        c = f_g * c + i_g * g_g
        h = o_g * jnp.tanh(c)
        # second_linear's T-contraction folded in: off the h->h serial chain.
        for o in range(out_T):
            acc[o] = acc[o] + l2w_sm_ref[o, t] * h

    acc_h = jnp.stack(acc, axis=0).reshape(out_T * B, H)  # free (leading dims)
    res_h = jnp.dot(acc_h, l1wh_ref[...], preferred_element_type=f32)  # (out_T*B, N)

    # --- conv head: two dense, full-lane dots ---------------------------------
    tmp_c = jnp.dot(l2w_ref[...], c3, preferred_element_type=f32)       # (out_T, B*N)
    res_c = jnp.dot(tmp_c, wbd_ref[...], preferred_element_type=f32)    # (out_T, B*N)

    # --- join: conv slab (b on lanes) -> (out_T, B, N) output (b on sublanes) --
    # The only relayout in the kernel; B small slice+stores at the tail.
    for b in range(B):
        out_ref[:, b:b + 1, :] = res_c[:, b * N:(b + 1) * N].reshape(out_T, 1, N)
    out_ref[...] = (out_ref[...]
                    + res_h.reshape(out_T, B, N)
                    + head_b_ref[...][:, None, :])


# -----------------------------------------------------------------------------
# Wrapper: parameter-only preprocessing + pallas_call (gridless).
# TODO(synk): if B is scaled up, add a leading "parallel" grid axis over B (with
# constant index_maps for all weights) and re-derive the VMEM budget for v7x.
# -----------------------------------------------------------------------------
def cltfp_forward(x, p, out_timesteps):
    B, T, N = x.shape
    C = p['w1'].shape[0]
    H = p['whh'].shape[1]
    k1, k2, k3 = p['w1'].shape[2], p['w2'].shape[2], p['w3'].shape[2]
    Lc = N - (k1 - 1) - (k2 - 1) - (k3 - 1)
    out_T = out_timesteps
    f32 = jnp.float32

    def fold_w(w):
        # (C_out, C_in, K) -> (C_out, K*C_in), k-major to match the slab rows.
        C_out, C_in, K = w.shape
        return jnp.transpose(w, (0, 2, 1)).reshape(C_out, K * C_in)

    x_tm3 = jnp.transpose(x, (1, 0, 2))                    # (T, B, N)
    x_conv = x_tm3.reshape(T, B * N)                       # conv slab view
    x_tm = x_tm3.reshape(T * B, N)                         # time-major LSTM view

    lstm_b = (p['bih'] + p['bhh']).reshape(1, 4 * H)
    l1_wt = p['l1w'].T                                     # (Lc+H, N)
    l1w_c = l1_wt[:Lc]                                     # conv-feature rows
    l1w_h = l1_wt[Lc:]                                     # lstm-feature rows
    # Per-batch block-diagonal L-contraction weight; rows >= Lc zero so garbage
    # lanes in the conv slab never reach the output.
    blk = jnp.zeros((N, N), f32).at[:Lc, :].set(l1w_c)
    wbd = jnp.kron(jnp.eye(B, dtype=f32), blk)             # (B*N, B*N)
    # l1 bias folded through the T-contraction of the second linear.
    head_b = (p['l2w'].sum(axis=1)[:, None] * p['l1b'][None, :]
              + p['l2b'][:, None])                         # (out_T, N)

    args = (
        x_conv, x_tm,
        fold_w(p['w1']), p['b1'].reshape(C, 1),
        fold_w(p['w2']), p['b2'].reshape(C, 1),
        fold_w(p['w3']), p['b3'].reshape(T, 1),
        p['wih'].T, p['whh'].T, lstm_b,
        p['l2w'],            # VMEM copy (T-contraction matmul)
        p['l2w'],            # SMEM copy (per-step scalar reads)
        l1w_h, wbd, head_b,
    )

    vmem = pl.BlockSpec(memory_space=pltpu.MemorySpace.VMEM)
    smem = pl.BlockSpec(memory_space=pltpu.MemorySpace.SMEM)
    in_specs = [vmem] * 12 + [smem] + [vmem] * 3

    out = pl.pallas_call(
        cltfp_kernel,
        out_shape=jax.ShapeDtypeStruct((out_T, B, N), jnp.float32),
        in_specs=in_specs,
        out_specs=vmem,
        cost_estimate=pl.CostEstimate(flops=600_000, transcendentals=6_200,
                                      bytes_accessed=95_000),
    )(*args)
    return jnp.transpose(out, (1, 0, 2))                   # (B, out_T, N)


# -----------------------------------------------------------------------------
# Deterministic parameter init (shapes follow the PyTorch module's __init__)
# -----------------------------------------------------------------------------
def init_params(key, T, out_T, C, k1, k2, k3, N, H):
    ks = jax.random.split(key, 14)
    u = lambda k, s: jax.random.uniform(k, s, jnp.float32, -0.2, 0.2)
    Fin = N - (k1 - 1) - (k2 - 1) - (k3 - 1) + H
    return dict(
        w1=u(ks[0], (C, T, k1)), b1=u(ks[1], (C,)),
        w2=u(ks[2], (C, C, k2)), b2=u(ks[3], (C,)),
        w3=u(ks[4], (T, C, k3)), b3=u(ks[5], (T,)),
        wih=u(ks[6], (4 * H, N)), whh=u(ks[7], (4 * H, H)),
        bih=u(ks[8], (4 * H,)), bhh=u(ks[9], (4 * H,)),
        l1w=u(ks[10], (N, Fin)), l1b=u(ks[11], (N,)),
        l2w=u(ks[12], (out_T, T)), l2b=u(ks[13], (out_T,)),
    )


# -----------------------------------------------------------------------------
# Pure-JAX reference (mirrors PyTorch forward semantics) for verification
# -----------------------------------------------------------------------------
def reference_forward(x, p):
    def conv_relu(inp, w, b):
        out = lax.conv_general_dilated(inp, w, (1,), 'VALID',
                                       dimension_numbers=('NCH', 'OIH', 'NCH'))
        return jax.nn.relu(out + b[None, :, None])

    c = conv_relu(x, p['w1'], p['b1'])
    c = conv_relu(c, p['w2'], p['b2'])
    c = conv_relu(c, p['w3'], p['b3'])

    H = p['whh'].shape[1]
    B = x.shape[0]

    def step(carry, x_t):
        h, cc = carry
        gates = x_t @ p['wih'].T + h @ p['whh'].T + p['bih'] + p['bhh']
        i, f, g, o = jnp.split(gates, 4, axis=-1)
        i, f, g, o = jax.nn.sigmoid(i), jax.nn.sigmoid(f), jnp.tanh(g), jax.nn.sigmoid(o)
        cc = f * cc + i * g
        h = o * jnp.tanh(cc)
        return (h, cc), h

    _, hs = lax.scan(step, (jnp.zeros((B, H)), jnp.zeros((B, H))),
                     jnp.swapaxes(x, 0, 1))
    out_lstm = jnp.swapaxes(hs, 0, 1)                       # (B, T, H)

    cat = jnp.concatenate([c, out_lstm], axis=2)
    out = cat @ p['l1w'].T + p['l1b']                       # (B, T, N)
    out = jnp.transpose(out, (0, 2, 1))                     # (B, N, T)
    out = out @ p['l2w'].T + p['l2b']                       # (B, N, out_T)
    return jnp.transpose(out, (0, 2, 1))                    # (B, out_T, N)


if __name__ == "__main__":
    # Small shapes consistent with the module; B=8 fills f32 sublanes and B*N=128
    # makes the conv slab exactly lane-dense.
    B, T, N = 8, 8, 16            # batch, in_timesteps, num_nodes
    out_T = 4                     # out_timesteps
    C = 8                         # out_cnn_channels
    k1 = k2 = k3 = 3              # conv kernels
    H = 16                        # lstm_hidden_channels

    key = jax.random.PRNGKey(0)
    kx, kp = jax.random.split(key)
    x = jax.random.normal(kx, (B, T, N), dtype=jnp.float32)
    params = init_params(kp, T, out_T, C, k1, k2, k3, N, H)

    out = cltfp_forward(x, params, out_T)
    out = jax.block_until_ready(out)

    ref = reference_forward(x, params)
    assert out.shape == (B, out_T, N), out.shape
    assert jnp.allclose(out, ref, atol=1e-3, rtol=1e-3), \
        float(jnp.max(jnp.abs(out - ref)))
    print("KERNEL_OK")
</pallas_src>

<mosaic_0001>
module attributes {stable_mosaic.version = 11 : i64} {
  func.func @cltfp_kernel(%arg0: memref<8x128xf32, #tpu.memory_space<vmem>>, %arg1: memref<64x16xf32, #tpu.memory_space<vmem>>, %arg2: memref<8x24xf32, #tpu.memory_space<vmem>>, %arg3: memref<8x1xf32, #tpu.memory_space<vmem>>, %arg4: memref<8x24xf32, #tpu.memory_space<vmem>>, %arg5: memref<8x1xf32, #tpu.memory_space<vmem>>, %arg6: memref<8x24xf32, #tpu.memory_space<vmem>>, %arg7: memref<8x1xf32, #tpu.memory_space<vmem>>, %arg8: memref<16x64xf32, #tpu.memory_space<vmem>>, %arg9: memref<16x64xf32, #tpu.memory_space<vmem>>, %arg10: memref<1x64xf32, #tpu.memory_space<vmem>>, %arg11: memref<4x8xf32, #tpu.memory_space<vmem>>, %arg12: memref<4x8xf32, #tpu.memory_space<smem>>, %arg13: memref<16x16xf32, #tpu.memory_space<vmem>>, %arg14: memref<128x128xf32, #tpu.memory_space<vmem>>, %arg15: memref<4x16xf32, #tpu.memory_space<vmem>>, %arg16: memref<4x8x16xf32, #tpu.memory_space<vmem>>) attributes {dimension_semantics = [], scalar_prefetch = 0 : i64, scratch_operands = 0 : i64, tpu.core_type = #tpu.core_type<tc>} {
    %c0 = arith.constant 0 : index
    %c0_0 = arith.constant 0 : index
    %0 = vector.load %arg0[%c0, %c0_0] : memref<8x128xf32, #tpu.memory_space<vmem>>, vector<8x128xf32>
    %1 = vector.extract_strided_slice %0 {offsets = [0, 1], sizes = [8, 127], strides = [1, 1]} : vector<8x128xf32> to vector<8x127xf32>
    %2 = vector.extract_strided_slice %0 {offsets = [0, 0], sizes = [8, 1], strides = [1, 1]} : vector<8x128xf32> to vector<8x1xf32>
    %3 = tpu.concatenate %1, %2 in 1 : vector<8x127xf32>, vector<8x1xf32> -> vector<8x128xf32>
    %4 = vector.extract_strided_slice %0 {offsets = [0, 2], sizes = [8, 126], strides = [1, 1]} : vector<8x128xf32> to vector<8x126xf32>
    %5 = vector.extract_strided_slice %0 {offsets = [0, 0], sizes = [8, 2], strides = [1, 1]} : vector<8x128xf32> to vector<8x2xf32>
    %6 = tpu.concatenate %4, %5 in 1 : vector<8x126xf32>, vector<8x2xf32> -> vector<8x128xf32>
    %7 = tpu.concatenate %0, %3, %6 in 0 : vector<8x128xf32>, vector<8x128xf32>, vector<8x128xf32> -> vector<24x128xf32>
    %c0_1 = arith.constant 0 : index
    %c0_2 = arith.constant 0 : index
    %8 = vector.load %arg2[%c0_1, %c0_2] : memref<8x24xf32, #tpu.memory_space<vmem>>, vector<8x24xf32>
    %cst = arith.constant dense<0.000000e+00> : vector<8x128xf32>
    %9 = tpu.matmul %8, %7, %cst {dimension_numbers = #tpu.dot_dimension_numbers<[1], [0], [0], [1], [0, 0, 1, 1], [], []>} : vector<8x24xf32>, vector<24x128xf32>, vector<8x128xf32> -> vector<8x128xf32>
    %c0_3 = arith.constant 0 : index
    %c0_4 = arith.constant 0 : index
    %10 = vector.load %arg3[%c0_3, %c0_4] : memref<8x1xf32, #tpu.memory_space<vmem>>, vector<8x1xf32>
    %11 = vector.broadcast %10 : vector<8x1xf32> to vector<8x128xf32>
    %12 = arith.addf %9, %11 : vector<8x128xf32>
    %cst_5 = arith.constant 0.000000e+00 : f32
    %13 = vector.broadcast %cst_5 : f32 to vector<8x128xf32>
    %14 = arith.maximumf %12, %13 : vector<8x128xf32>
    %15 = vector.extract_strided_slice %14 {offsets = [0, 1], sizes = [8, 127], strides = [1, 1]} : vector<8x128xf32> to vector<8x127xf32>
    %16 = vector.extract_strided_slice %14 {offsets = [0, 0], sizes = [8, 1], strides = [1, 1]} : vector<8x128xf32> to vector<8x1xf32>
    %17 = tpu.concatenate %15, %16 in 1 : vector<8x127xf32>, vector<8x1xf32> -> vector<8x128xf32>
    %18 = vector.extract_strided_slice %14 {offsets = [0, 2], sizes = [8, 126], strides = [1, 1]} : vector<8x128xf32> to vector<8x126xf32>
    %19 = vector.extract_strided_slice %14 {offsets = [0, 0], sizes = [8, 2], strides = [1, 1]} : vector<8x128xf32> to vector<8x2xf32>
    %20 = tpu.concatenate %18, %19 in 1 : vector<8x126xf32>, vector<8x2xf32> -> vector<8x128xf32>
    %21 = tpu.concatenate %14, %17, %20 in 0 : vector<8x128xf32>, vector<8x128xf32>, vector<8x128xf32> -> vector<24x128xf32>
    %c0_6 = arith.constant 0 : index
    %c0_7 = arith.constant 0 : index
    %22 = vector.load %arg4[%c0_6, %c0_7] : memref<8x24xf32, #tpu.memory_space<vmem>>, vector<8x24xf32>
    %cst_8 = arith.constant dense<0.000000e+00> : vector<8x128xf32>
    %23 = tpu.matmul %22, %21, %cst_8 {dimension_numbers = #tpu.dot_dimension_numbers<[1], [0], [0], [1], [0, 0, 1, 1], [], []>} : vector<8x24xf32>, vector<24x128xf32>, vector<8x128xf32> -> vector<8x128xf32>
    %c0_9 = arith.constant 0 : index
    %c0_10 = arith.constant 0 : index
    %24 = vector.load %arg5[%c0_9, %c0_10] : memref<8x1xf32, #tpu.memory_space<vmem>>, vector<8x1xf32>
    %25 = vector.broadcast %24 : vector<8x1xf32> to vector<8x128xf32>
    %26 = arith.addf %23, %25 : vector<8x128xf32>
    %cst_11 = arith.constant 0.000000e+00 : f32
    %27 = vector.broadcast %cst_11 : f32 to vector<8x128xf32>
    %28 = arith.maximumf %26, %27 : vector<8x128xf32>
    %29 = vector.extract_strided_slice %28 {offsets = [0, 1], sizes = [8, 127], strides = [1, 1]} : vector<8x128xf32> to vector<8x127xf32>
    %30 = vector.extract_strided_slice %28 {offsets = [0, 0], sizes = [8, 1], strides = [1, 1]} : vector<8x128xf32> to vector<8x1xf32>
    %31 = tpu.concatenate %29, %30 in 1 : vector<8x127xf32>, vector<8x1xf32> -> vector<8x128xf32>
    %32 = vector.extract_strided_slice %28 {offsets = [0, 2], sizes = [8, 126], strides = [1, 1]} : vector<8x128xf32> to vector<8x126xf32>
    %33 = vector.extract_strided_slice %28 {offsets = [0, 0], sizes = [8, 2], strides = [1, 1]} : vector<8x128xf32> to vector<8x2xf32>
    %34 = tpu.concatenate %32, %33 in 1 : vector<8x126xf32>, vector<8x2xf32> -> vector<8x128xf32>
    %35 = tpu.concatenate %28, %31, %34 in 0 : vector<8x128xf32>, vector<8x128xf32>, vector<8x128xf32> -> vector<24x128xf32>
    %c0_12 = arith.constant 0 : index
    %c0_13 = arith.constant 0 : index
    %36 = vector.load %arg6[%c0_12, %c0_13] : memref<8x24xf32, #tpu.memory_space<vmem>>, vector<8x24xf32>
    %cst_14 = arith.constant dense<0.000000e+00> : vector<8x128xf32>
    %37 = tpu.matmul %36, %35, %cst_14 {dimension_numbers = #tpu.dot_dimension_numbers<[1], [0], [0], [1], [0, 0, 1, 1], [], []>} : vector<8x24xf32>, vector<24x128xf32>, vector<8x128xf32> -> vector<8x128xf32>
    %c0_15 = arith.constant 0 : index
    %c0_16 = arith.constant 0 : index
    %38 = vector.load %arg7[%c0_15, %c0_16] : memref<8x1xf32, #tpu.memory_space<vmem>>, vector<8x1xf32>
    %39 = vector.broadcast %38 : vector<8x1xf32> to vector<8x128xf32>
    %40 = arith.addf %37, %39 : vector<8x128xf32>
    %cst_17 = arith.constant 0.000000e+00 : f32
    %41 = vector.broadcast %cst_17 : f32 to vector<8x128xf32>
    %42 = arith.maximumf %40, %41 : vector<8x128xf32>
    %c0_18 = arith.constant 0 : index
    %c0_19 = arith.constant 0 : index
    %43 = vector.load %arg1[%c0_18, %c0_19] : memref<64x16xf32, #tpu.memory_space<vmem>>, vector<64x16xf32>
    %c0_20 = arith.constant 0 : index
    %c0_21 = arith.constant 0 : index
    %44 = vector.load %arg8[%c0_20, %c0_21] : memref<16x64xf32, #tpu.memory_space<vmem>>, vector<16x64xf32>
    %cst_22 = arith.constant dense<0.000000e+00> : vector<64x64xf32>
    %45 = tpu.matmul %43, %44, %cst_22 {dimension_numbers = #tpu.dot_dimension_numbers<[1], [0], [0], [1], [0, 0, 1, 1], [], []>} : vector<64x16xf32>, vector<16x64xf32>, vector<64x64xf32> -> vector<64x64xf32>
    %c0_23 = arith.constant 0 : index
    %c0_24 = arith.constant 0 : index
    %46 = vector.load %arg10[%c0_23, %c0_24] : memref<1x64xf32, #tpu.memory_space<vmem>>, vector<1x64xf32>
    %47 = vector.broadcast %46 : vector<1x64xf32> to vector<64x64xf32>
    %48 = arith.addf %45, %47 : vector<64x64xf32>
    %49 = vector.shape_cast %48 : vector<64x64xf32> to vector<8x8x64xf32>
    %c0_25 = arith.constant 0 : index
    %c0_26 = arith.constant 0 : index
    %50 = vector.load %arg9[%c0_25, %c0_26] : memref<16x64xf32, #tpu.memory_space<vmem>>, vector<16x64xf32>
    %cst_27 = arith.constant 0.000000e+00 : f32
    %51 = vector.broadcast %cst_27 : f32 to vector<8x16xf32>
    %cst_28 = arith.constant 0.000000e+00 : f32
    %52 = vector.broadcast %cst_28 : f32 to vector<8x16xf32>
    %cst_29 = arith.constant 0.000000e+00 : f32
    %53 = vector.broadcast %cst_29 : f32 to vector<8x16xf32>
    %cst_30 = arith.constant 0.000000e+00 : f32
    %54 = vector.broadcast %cst_30 : f32 to vector<8x16xf32>
    %cst_31 = arith.constant 0.000000e+00 : f32
    %55 = vector.broadcast %cst_31 : f32 to vector<8x16xf32>
    %cst_32 = arith.constant 0.000000e+00 : f32
    %56 = vector.broadcast %cst_32 : f32 to vector<8x16xf32>
    %57 = vector.extract_strided_slice %49 {offsets = [0, 0, 0], sizes = [1, 8, 64], strides = [1, 1, 1]} : vector<8x8x64xf32> to vector<1x8x64xf32>
    %58 = vector.shape_cast %57 : vector<1x8x64xf32> to vector<8x64xf32>
    %cst_33 = arith.constant dense<0.000000e+00> : vector<8x64xf32>
    %59 = tpu.matmul %51, %50, %cst_33 {dimension_numbers = #tpu.dot_dimension_numbers<[1], [0], [0], [1], [0, 0, 1, 1], [], []>} : vector<8x16xf32>, vector<16x64xf32>, vector<8x64xf32> -> vector<8x64xf32>
    %60 = arith.addf %58, %59 : vector<8x64xf32>
    %61 = arith.negf %60 : vector<8x64xf32>
    %62 = math.exp %61 : vector<8x64xf32>
    %cst_34 = arith.constant 1.000000e+00 : f32
    %63 = vector.broadcast %cst_34 : f32 to vector<8x64xf32>
    %64 = arith.addf %63, %62 : vector<8x64xf32>
    %65 = arith.divf %63, %64 : vector<8x64xf32>
    %66 = vector.extract_strided_slice %60 {offsets = [0, 32], sizes = [8, 16], strides = [1, 1]} : vector<8x64xf32> to vector<8x16xf32>
    %67 = math.tanh %66 : vector<8x16xf32>
    %68 = vector.extract_strided_slice %65 {offsets = [0, 0], sizes = [8, 16], strides = [1, 1]} : vector<8x64xf32> to vector<8x16xf32>
    %69 = vector.extract_strided_slice %65 {offsets = [0, 16], sizes = [8, 16], strides = [1, 1]} : vector<8x64xf32> to vector<8x16xf32>
    %70 = vector.extract_strided_slice %65 {offsets = [0, 48], sizes = [8, 16], strides = [1, 1]} : vector<8x64xf32> to vector<8x16xf32>
    %71 = arith.mulf %69, %52 : vector<8x16xf32>
    %72 = arith.mulf %68, %67 : vector<8x16xf32>
    %73 = arith.addf %71, %72 : vector<8x16xf32>
    %74 = math.tanh %73 : vector<8x16xf32>
    %75 = arith.mulf %70, %74 : vector<8x16xf32>
    %c0_35 = arith.constant 0 : index
    %c0_36 = arith.constant 0 : index
    %76 = memref.load %arg12[%c0_35, %c0_36] : memref<4x8xf32, #tpu.memory_space<smem>>
    %77 = vector.broadcast %76 : f32 to vector<8x16xf32>
    %78 = arith.mulf %77, %75 : vector<8x16xf32>
    %79 = arith.addf %53, %78 : vector<8x16xf32>
    %c1 = arith.constant 1 : index
    %c0_37 = arith.constant 0 : index
    %80 = memref.load %arg12[%c1, %c0_37] : memref<4x8xf32, #tpu.memory_space<smem>>
    %81 = vector.broadcast %80 : f32 to vector<8x16xf32>
    %82 = arith.mulf %81, %75 : vector<8x16xf32>
    %83 = arith.addf %54, %82 : vector<8x16xf32>
    %c2 = arith.constant 2 : index
    %c0_38 = arith.constant 0 : index
    %84 = memref.load %arg12[%c2, %c0_38] : memref<4x8xf32, #tpu.memory_space<smem>>
    %85 = vector.broadcast %84 : f32 to vector<8x16xf32>
    %86 = arith.mulf %85, %75 : vector<8x16xf32>
    %87 = arith.addf %55, %86 : vector<8x16xf32>
    %c3 = arith.constant 3 : index
    %c0_39 = arith.constant 0 : index
    %88 = memref.load %arg12[%c3, %c0_39] : memref<4x8xf32, #tpu.memory_space<smem>>
    %89 = vector.broadcast %88 : f32 to vector<8x16xf32>
    %90 = arith.mulf %89, %75 : vector<8x16xf32>
    %91 = arith.addf %56, %90 : vector<8x16xf32>
    %92 = vector.extract_strided_slice %49 {offsets = [1, 0, 0], sizes = [1, 8, 64], strides = [1, 1, 1]} : vector<8x8x64xf32> to vector<1x8x64xf32>
    %93 = vector.shape_cast %92 : vector<1x8x64xf32> to vector<8x64xf32>
    %cst_40 = arith.constant dense<0.000000e+00> : vector<8x64xf32>
    %94 = tpu.matmul %75, %50, %cst_40 {dimension_numbers = #tpu.dot_dimension_numbers<[1], [0], [0], [1], [0, 0, 1, 1], [], []>} : vector<8x16xf32>, vector<16x64xf32>, vector<8x64xf32> -> vector<8x64xf32>
    %95 = arith.addf %93, %94 : vector<8x64xf32>
    %96 = arith.negf %95 : vector<8x64xf32>
    %97 = math.exp %96 : vector<8x64xf32>
    %cst_41 = arith.constant 1.000000e+00 : f32
    %98 = vector.broadcast %cst_41 : f32 to vector<8x64xf32>
    %99 = arith.addf %98, %97 : vector<8x64xf32>
    %100 = arith.divf %98, %99 : vector<8x64xf32>
    %101 = vector.extract_strided_slice %95 {offsets = [0, 32], sizes = [8, 16], strides = [1, 1]} : vector<8x64xf32> to vector<8x16xf32>
    %102 = math.tanh %101 : vector<8x16xf32>
    %103 = vector.extract_strided_slice %100 {offsets = [0, 0], sizes = [8, 16], strides = [1, 1]} : vector<8x64xf32> to vector<8x16xf32>
    %104 = vector.extract_strided_slice %100 {offsets = [0, 16], sizes = [8, 16], strides = [1, 1]} : vector<8x64xf32> to vector<8x16xf32>
    %105 = vector.extract_strided_slice %100 {offsets = [0, 48], sizes = [8, 16], strides = [1, 1]} : vector<8x64xf32> to vector<8x16xf32>
    %106 = arith.mulf %104, %73 : vector<8x16xf32>
    %107 = arith.mulf %103, %102 : vector<8x16xf32>
    %108 = arith.addf %106, %107 : vector<8x16xf32>
    %109 = math.tanh %108 : vector<8x16xf32>
    %110 = arith.mulf %105, %109 : vector<8x16xf32>
    %c0_42 = arith.constant 0 : index
    %c1_43 = arith.constant 1 : index
    %111 = memref.load %arg12[%c0_42, %c1_43] : memref<4x8xf32, #tpu.memory_space<smem>>
    %112 = vector.broadcast %111 : f32 to vector<8x16xf32>
    %113 = arith.mulf %112, %110 : vector<8x16xf32>
    %114 = arith.addf %79, %113 : vector<8x16xf32>
    %c1_44 = arith.constant 1 : index
    %c1_45 = arith.constant 1 : index
    %115 = memref.load %arg12[%c1_44, %c1_45] : memref<4x8xf32, #tpu.memory_space<smem>>
    %116 = vector.broadcast %115 : f32 to vector<8x16xf32>
    %117 = arith.mulf %116, %110 : vector<8x16xf32>
    %118 = arith.addf %83, %117 : vector<8x16xf32>
    %c2_46 = arith.constant 2 : index
    %c1_47 = arith.constant 1 : index
    %119 = memref.load %arg12[%c2_46, %c1_47] : memref<4x8xf32, #tpu.memory_space<smem>>
    %120 = vector.broadcast %119 : f32 to vector<8x16xf32>
    %121 = arith.mulf %120, %110 : vector<8x16xf32>
    %122 = arith.addf %87, %121 : vector<8x16xf32>
    %c3_48 = arith.constant 3 : index
    %c1_49 = arith.constant 1 : index
    %123 = memref.load %arg12[%c3_48, %c1_49] : memref<4x8xf32, #tpu.memory_space<smem>>
    %124 = vector.broadcast %123 : f32 to vector<8x16xf32>
    %125 = arith.mulf %124, %110 : vector<8x16xf32>
    %126 = arith.addf %91, %125 : vector<8x16xf32>
    %127 = vector.extract_strided_slice %49 {offsets = [2, 0, 0], sizes = [1, 8, 64], strides = [1, 1, 1]} : vector<8x8x64xf32> to vector<1x8x64xf32>
    %128 = vector.shape_cast %127 : vector<1x8x64xf32> to vector<8x64xf32>
    %cst_50 = arith.constant dense<0.000000e+00> : vector<8x64xf32>
    %129 = tpu.matmul %110, %50, %cst_50 {dimension_numbers = #tpu.dot_dimension_numbers<[1], [0], [0], [1], [0, 0, 1, 1], [], []>} : vector<8x16xf32>, vector<16x64xf32>, vector<8x64xf32> -> vector<8x64xf32>
    %130 = arith.addf %128, %129 : vector<8x64xf32>
    %131 = arith.negf %130 : vector<8x64xf32>
    %132 = math.exp %131 : vector<8x64xf32>
    %cst_51 = arith.constant 1.000000e+00 : f32
    %133 = vector.broadcast %cst_51 : f32 to vector<8x64xf32>
    %134 = arith.addf %133, %132 : vector<8x64xf32>
    %135 = arith.divf %133, %134 : vector<8x64xf32>
    %136 = vector.extract_strided_slice %130 {offsets = [0, 32], sizes = [8, 16], strides = [1, 1]} : vector<8x64xf32> to vector<8x16xf32>
    %137 = math.tanh %136 : vector<8x16xf32>
    %138 = vector.extract_strided_slice %135 {offsets = [0, 0], sizes = [8, 16], strides = [1, 1]} : vector<8x64xf32> to vector<8x16xf32>
    %139 = vector.extract_strided_slice %135 {offsets = [0, 16], sizes = [8, 16], strides = [1, 1]} : vector<8x64xf32> to vector<8x16xf32>
    %140 = vector.extract_strided_slice %135 {offsets = [0, 48], sizes = [8, 16], strides = [1, 1]} : vector<8x64xf32> to vector<8x16xf32>
    %141 = arith.mulf %139, %108 : vector<8x16xf32>
    %142 = arith.mulf %138, %137 : vector<8x16xf32>
    %143 = arith.addf %141, %142 : vector<8x16xf32>
    %144 = math.tanh %143 : vector<8x16xf32>
    %145 = arith.mulf %140, %144 : vector<8x16xf32>
    %c0_52 = arith.constant 0 : index
    %c2_53 = arith.constant 2 : index
    %146 = memref.load %arg12[%c0_52, %c2_53] : memref<4x8xf32, #tpu.memory_space<smem>>
    %147 = vector.broadcast %146 : f32 to vector<8x16xf32>
    %148 = arith.mulf %147, %145 : vector<8x16xf32>
    %149 = arith.addf %114, %148 : vector<8x16xf32>
    %c1_54 = arith.constant 1 : index
    %c2_55 = arith.constant 2 : index
    %150 = memref.load %arg12[%c1_54, %c2_55] : memref<4x8xf32, #tpu.memory_space<smem>>
    %151 = vector.broadcast %150 : f32 to vector<8x16xf32>
    %152 = arith.mulf %151, %145 : vector<8x16xf32>
    %153 = arith.addf %118, %152 : vector<8x16xf32>
    %c2_56 = arith.constant 2 : index
    %c2_57 = arith.constant 2 : index
    %154 = memref.load %arg12[%c2_56, %c2_57] : memref<4x8xf32, #tpu.memory_space<smem>>
    %155 = vector.broadcast %154 : f32 to vector<8x16xf32>
    %156 = arith.mulf %155, %145 : vector<8x16xf32>
    %157 = arith.addf %122, %156 : vector<8x16xf32>
    %c3_58 = arith.constant 3 : index
    %c2_59 = arith.constant 2 : index
    %158 = memref.load %arg12[%c3_58, %c2_59] : memref<4x8xf32, #tpu.memory_space<smem>>
    %159 = vector.broadcast %158 : f32 to vector<8x16xf32>
    %160 = arith.mulf %159, %145 : vector<8x16xf32>
    %161 = arith.addf %126, %160 : vector<8x16xf32>
    %162 = vector.extract_strided_slice %49 {offsets = [3, 0, 0], sizes = [1, 8, 64], strides = [1, 1, 1]} : vector<8x8x64xf32> to vector<1x8x64xf32>
    %163 = vector.shape_cast %162 : vector<1x8x64xf32> to vector<8x64xf32>
    %cst_60 = arith.constant dense<0.000000e+00> : vector<8x64xf32>
    %164 = tpu.matmul %145, %50, %cst_60 {dimension_numbers = #tpu.dot_dimension_numbers<[1], [0], [0], [1], [0, 0, 1, 1], [], []>} : vector<8x16xf32>, vector<16x64xf32>, vector<8x64xf32> -> vector<8x64xf32>
    %165 = arith.addf %163, %164 : vector<8x64xf32>
    %166 = arith.negf %165 : vector<8x64xf32>
    %167 = math.exp %166 : vector<8x64xf32>
    %cst_61 = arith.constant 1.000000e+00 : f32
    %168 = vector.broadcast %cst_61 : f32 to vector<8x64xf32>
    %169 = arith.addf %168, %167 : vector<8x64xf32>
    %170 = arith.divf %168, %169 : vector<8x64xf32>
    %171 = vector.extract_strided_slice %165 {offsets = [0, 32], sizes = [8, 16], strides = [1, 1]} : vector<8x64xf32> to vector<8x16xf32>
    %172 = math.tanh %171 : vector<8x16xf32>
    %173 = vector.extract_strided_slice %170 {offsets = [0, 0], sizes = [8, 16], strides = [1, 1]} : vector<8x64xf32> to vector<8x16xf32>
    %174 = vector.extract_strided_slice %170 {offsets = [0, 16], sizes = [8, 16], strides = [1, 1]} : vector<8x64xf32> to vector<8x16xf32>
    %175 = vector.extract_strided_slice %170 {offsets = [0, 48], sizes = [8, 16], strides = [1, 1]} : vector<8x64xf32> to vector<8x16xf32>
    %176 = arith.mulf %174, %143 : vector<8x16xf32>
    %177 = arith.mulf %173, %172 : vector<8x16xf32>
    %178 = arith.addf %176, %177 : vector<8x16xf32>
    %179 = math.tanh %178 : vector<8x16xf32>
    %180 = arith.mulf %175, %179 : vector<8x16xf32>
    %c0_62 = arith.constant 0 : index
    %c3_63 = arith.constant 3 : index
    %181 = memref.load %arg12[%c0_62, %c3_63] : memref<4x8xf32, #tpu.memory_space<smem>>
    %182 = vector.broadcast %181 : f32 to vector<8x16xf32>
    %183 = arith.mulf %182, %180 : vector<8x16xf32>
    %184 = arith.addf %149, %183 : vector<8x16xf32>
    %c1_64 = arith.constant 1 : index
    %c3_65 = arith.constant 3 : index
    %185 = memref.load %arg12[%c1_64, %c3_65] : memref<4x8xf32, #tpu.memory_space<smem>>
    %186 = vector.broadcast %185 : f32 to vector<8x16xf32>
    %187 = arith.mulf %186, %180 : vector<8x16xf32>
    %188 = arith.addf %153, %187 : vector<8x16xf32>
    %c2_66 = arith.constant 2 : index
    %c3_67 = arith.constant 3 : index
    %189 = memref.load %arg12[%c2_66, %c3_67] : memref<4x8xf32, #tpu.memory_space<smem>>
    %190 = vector.broadcast %189 : f32 to vector<8x16xf32>
    %191 = arith.mulf %190, %180 : vector<8x16xf32>
    %192 = arith.addf %157, %191 : vector<8x16xf32>
    %c3_68 = arith.constant 3 : index
    %c3_69 = arith.constant 3 : index
    %193 = memref.load %arg12[%c3_68, %c3_69] : memref<4x8xf32, #tpu.memory_space<smem>>
    %194 = vector.broadcast %193 : f32 to vector<8x16xf32>
    %195 = arith.mulf %194, %180 : vector<8x16xf32>
    %196 = arith.addf %161, %195 : vector<8x16xf32>
    %197 = vector.extract_strided_slice %49 {offsets = [4, 0, 0], sizes = [1, 8, 64], strides = [1, 1, 1]} : vector<8x8x64xf32> to vector<1x8x64xf32>
    %198 = vector.shape_cast %197 : vector<1x8x64xf32> to vector<8x64xf32>
    %cst_70 = arith.constant dense<0.000000e+00> : vector<8x64xf32>
    %199 = tpu.matmul %180, %50, %cst_70 {dimension_numbers = #tpu.dot_dimension_numbers<[1], [0], [0], [1], [0, 0, 1, 1], [], []>} : vector<8x16xf32>, vector<16x64xf32>, vector<8x64xf32> -> vector<8x64xf32>
    %200 = arith.addf %198, %199 : vector<8x64xf32>
    %201 = arith.negf %200 : vector<8x64xf32>
    %202 = math.exp %201 : vector<8x64xf32>
    %cst_71 = arith.constant 1.000000e+00 : f32
    %203 = vector.broadcast %cst_71 : f32 to vector<8x64xf32>
    %204 = arith.addf %203, %202 : vector<8x64xf32>
    %205 = arith.divf %203, %204 : vector<8x64xf32>
    %206 = vector.extract_strided_slice %200 {offsets = [0, 32], sizes = [8, 16], strides = [1, 1]} : vector<8x64xf32> to vector<8x16xf32>
    %207 = math.tanh %206 : vector<8x16xf32>
    %208 = vector.extract_strided_slice %205 {offsets = [0, 0], sizes = [8, 16], strides = [1, 1]} : vector<8x64xf32> to vector<8x16xf32>
    %209 = vector.extract_strided_slice %205 {offsets = [0, 16], sizes = [8, 16], strides = [1, 1]} : vector<8x64xf32> to vector<8x16xf32>
    %210 = vector.extract_strided_slice %205 {offsets = [0, 48], sizes = [8, 16], strides = [1, 1]} : vector<8x64xf32> to vector<8x16xf32>
    %211 = arith.mulf %209, %178 : vector<8x16xf32>
    %212 = arith.mulf %208, %207 : vector<8x16xf32>
    %213 = arith.addf %211, %212 : vector<8x16xf32>
    %214 = math.tanh %213 : vector<8x16xf32>
    %215 = arith.mulf %210, %214 : vector<8x16xf32>
    %c0_72 = arith.constant 0 : index
    %c4 = arith.constant 4 : index
    %216 = memref.load %arg12[%c0_72, %c4] : memref<4x8xf32, #tpu.memory_space<smem>>
    %217 = vector.broadcast %216 : f32 to vector<8x16xf32>
    %218 = arith.mulf %217, %215 : vector<8x16xf32>
    %219 = arith.addf %184, %218 : vector<8x16xf32>
    %c1_73 = arith.constant 1 : index
    %c4_74 = arith.constant 4 : index
    %220 = memref.load %arg12[%c1_73, %c4_74] : memref<4x8xf32, #tpu.memory_space<smem>>
    %221 = vector.broadcast %220 : f32 to vector<8x16xf32>
    %222 = arith.mulf %221, %215 : vector<8x16xf32>
    %223 = arith.addf %188, %222 : vector<8x16xf32>
    %c2_75 = arith.constant 2 : index
    %c4_76 = arith.constant 4 : index
    %224 = memref.load %arg12[%c2_75, %c4_76] : memref<4x8xf32, #tpu.memory_space<smem>>
    %225 = vector.broadcast %224 : f32 to vector<8x16xf32>
    %226 = arith.mulf %225, %215 : vector<8x16xf32>
    %227 = arith.addf %192, %226 : vector<8x16xf32>
    %c3_77 = arith.constant 3 : index
    %c4_78 = arith.constant 4 : index
    %228 = memref.load %arg12[%c3_77, %c4_78] : memref<4x8xf32, #tpu.memory_space<smem>>
    %229 = vector.broadcast %228 : f32 to vector<8x16xf32>
    %230 = arith.mulf %229, %215 : vector<8x16xf32>
    %231 = arith.addf %196, %230 : vector<8x16xf32>
    %232 = vector.extract_strided_slice %49 {offsets = [5, 0, 0], sizes = [1, 8, 64], strides = [1, 1, 1]} : vector<8x8x64xf32> to vector<1x8x64xf32>
    %233 = vector.shape_cast %232 : vector<1x8x64xf32> to vector<8x64xf32>
    %cst_79 = arith.constant dense<0.000000e+00> : vector<8x64xf32>
    %234 = tpu.matmul %215, %50, %cst_79 {dimension_numbers = #tpu.dot_dimension_numbers<[1], [0], [0], [1], [0, 0, 1, 1], [], []>} : vector<8x16xf32>, vector<16x64xf32>, vector<8x64xf32> -> vector<8x64xf32>
    %235 = arith.addf %233, %234 : vector<8x64xf32>
    %236 = arith.negf %235 : vector<8x64xf32>
    %237 = math.exp %236 : vector<8x64xf32>
    %cst_80 = arith.constant 1.000000e+00 : f32
    %238 = vector.broadcast %cst_80 : f32 to vector<8x64xf32>
    %239 = arith.addf %238, %237 : vector<8x64xf32>
    %240 = arith.divf %238, %239 : vector<8x64xf32>
    %241 = vector.extract_strided_slice %235 {offsets = [0, 32], sizes = [8, 16], strides = [1, 1]} : vector<8x64xf32> to vector<8x16xf32>
    %242 = math.tanh %241 : vector<8x16xf32>
    %243 = vector.extract_strided_slice %240 {offsets = [0, 0], sizes = [8, 16], strides = [1, 1]} : vector<8x64xf32> to vector<8x16xf32>
    %244 = vector.extract_strided_slice %240 {offsets = [0, 16], sizes = [8, 16], strides = [1, 1]} : vector<8x64xf32> to vector<8x16xf32>
    %245 = vector.extract_strided_slice %240 {offsets = [0, 48], sizes = [8, 16], strides = [1, 1]} : vector<8x64xf32> to vector<8x16xf32>
    %246 = arith.mulf %244, %213 : vector<8x16xf32>
    %247 = arith.mulf %243, %242 : vector<8x16xf32>
    %248 = arith.addf %246, %247 : vector<8x16xf32>
    %249 = math.tanh %248 : vector<8x16xf32>
    %250 = arith.mulf %245, %249 : vector<8x16xf32>
    %c0_81 = arith.constant 0 : index
    %c5 = arith.constant 5 : index
    %251 = memref.load %arg12[%c0_81, %c5] : memref<4x8xf32, #tpu.memory_space<smem>>
    %252 = vector.broadcast %251 : f32 to vector<8x16xf32>
    %253 = arith.mulf %252, %250 : vector<8x16xf32>
    %254 = arith.addf %219, %253 : vector<8x16xf32>
    %c1_82 = arith.constant 1 : index
    %c5_83 = arith.constant 5 : index
    %255 = memref.load %arg12[%c1_82, %c5_83] : memref<4x8xf32, #tpu.memory_space<smem>>
    %256 = vector.broadcast %255 : f32 to vector<8x16xf32>
    %257 = arith.mulf %256, %250 : vector<8x16xf32>
    %258 = arith.addf %223, %257 : vector<8x16xf32>
    %c2_84 = arith.constant 2 : index
    %c5_85 = arith.constant 5 : index
    %259 = memref.load %arg12[%c2_84, %c5_85] : memref<4x8xf32, #tpu.memory_space<smem>>
    %260 = vector.broadcast %259 : f32 to vector<8x16xf32>
    %261 = arith.mulf %260, %250 : vector<8x16xf32>
    %262 = arith.addf %227, %261 : vector<8x16xf32>
    %c3_86 = arith.constant 3 : index
    %c5_87 = arith.constant 5 : index
    %263 = memref.load %arg12[%c3_86, %c5_87] : memref<4x8xf32, #tpu.memory_space<smem>>
    %264 = vector.broadcast %263 : f32 to vector<8x16xf32>
    %265 = arith.mulf %264, %250 : vector<8x16xf32>
    %266 = arith.addf %231, %265 : vector<8x16xf32>
    %267 = vector.extract_strided_slice %49 {offsets = [6, 0, 0], sizes = [1, 8, 64], strides = [1, 1, 1]} : vector<8x8x64xf32> to vector<1x8x64xf32>
    %268 = vector.shape_cast %267 : vector<1x8x64xf32> to vector<8x64xf32>
    %cst_88 = arith.constant dense<0.000000e+00> : vector<8x64xf32>
    %269 = tpu.matmul %250, %50, %cst_88 {dimension_numbers = #tpu.dot_dimension_numbers<[1], [0], [0], [1], [0, 0, 1, 1], [], []>} : vector<8x16xf32>, vector<16x64xf32>, vector<8x64xf32> -> vector<8x64xf32>
    %270 = arith.addf %268, %269 : vector<8x64xf32>
    %271 = arith.negf %270 : vector<8x64xf32>
    %272 = math.exp %271 : vector<8x64xf32>
    %cst_89 = arith.constant 1.000000e+00 : f32
    %273 = vector.broadcast %cst_89 : f32 to vector<8x64xf32>
    %274 = arith.addf %273, %272 : vector<8x64xf32>
    %275 = arith.divf %273, %274 : vector<8x64xf32>
    %276 = vector.extract_strided_slice %270 {offsets = [0, 32], sizes = [8, 16], strides = [1, 1]} : vector<8x64xf32> to vector<8x16xf32>
    %277 = math.tanh %276 : vector<8x16xf32>
    %278 = vector.extract_strided_slice %275 {offsets = [0, 0], sizes = [8, 16], strides = [1, 1]} : vector<8x64xf32> to vector<8x16xf32>
    %279 = vector.extract_strided_slice %275 {offsets = [0, 16], sizes = [8, 16], strides = [1, 1]} : vector<8x64xf32> to vector<8x16xf32>
    %280 = vector.extract_strided_slice %275 {offsets = [0, 48], sizes = [8, 16], strides = [1, 1]} : vector<8x64xf32> to vector<8x16xf32>
    %281 = arith.mulf %279, %248 : vector<8x16xf32>
    %282 = arith.mulf %278, %277 : vector<8x16xf32>
    %283 = arith.addf %281, %282 : vector<8x16xf32>
    %284 = math.tanh %283 : vector<8x16xf32>
    %285 = arith.mulf %280, %284 : vector<8x16xf32>
    %c0_90 = arith.constant 0 : index
    %c6 = arith.constant 6 : index
    %286 = memref.load %arg12[%c0_90, %c6] : memref<4x8xf32, #tpu.memory_space<smem>>
    %287 = vector.broadcast %286 : f32 to vector<8x16xf32>
    %288 = arith.mulf %287, %285 : vector<8x16xf32>
    %289 = arith.addf %254, %288 : vector<8x16xf32>
    %c1_91 = arith.constant 1 : index
    %c6_92 = arith.constant 6 : index
    %290 = memref.load %arg12[%c1_91, %c6_92] : memref<4x8xf32, #tpu.memory_space<smem>>
    %291 = vector.broadcast %290 : f32 to vector<8x16xf32>
    %292 = arith.mulf %291, %285 : vector<8x16xf32>
    %293 = arith.addf %258, %292 : vector<8x16xf32>
    %c2_93 = arith.constant 2 : index
    %c6_94 = arith.constant 6 : index
    %294 = memref.load %arg12[%c2_93, %c6_94] : memref<4x8xf32, #tpu.memory_space<smem>>
    %295 = vector.broadcast %294 : f32 to vector<8x16xf32>
    %296 = arith.mulf %295, %285 : vector<8x16xf32>
    %297 = arith.addf %262, %296 : vector<8x16xf32>
    %c3_95 = arith.constant 3 : index
    %c6_96 = arith.constant 6 : index
    %298 = memref.load %arg12[%c3_95, %c6_96] : memref<4x8xf32, #tpu.memory_space<smem>>
    %299 = vector.broadcast %298 : f32 to vector<8x16xf32>
    %300 = arith.mulf %299, %285 : vector<8x16xf32>
    %301 = arith.addf %266, %300 : vector<8x16xf32>
    %302 = vector.extract_strided_slice %49 {offsets = [7, 0, 0], sizes = [1, 8, 64], strides = [1, 1, 1]} : vector<8x8x64xf32> to vector<1x8x64xf32>
    %303 = vector.shape_cast %302 : vector<1x8x64xf32> to vector<8x64xf32>
    %cst_97 = arith.constant dense<0.000000e+00> : vector<8x64xf32>
    %304 = tpu.matmul %285, %50, %cst_97 {dimension_numbers = #tpu.dot_dimension_numbers<[1], [0], [0], [1], [0, 0, 1, 1], [], []>} : vector<8x16xf32>, vector<16x64xf32>, vector<8x64xf32> -> vector<8x64xf32>
    %305 = arith.addf %303, %304 : vector<8x64xf32>
    %306 = arith.negf %305 : vector<8x64xf32>
    %307 = math.exp %306 : vector<8x64xf32>
    %cst_98 = arith.constant 1.000000e+00 : f32
    %308 = vector.broadcast %cst_98 : f32 to vector<8x64xf32>
    %309 = arith.addf %308, %307 : vector<8x64xf32>
    %310 = arith.divf %308, %309 : vector<8x64xf32>
    %311 = vector.extract_strided_slice %305 {offsets = [0, 32], sizes = [8, 16], strides = [1, 1]} : vector<8x64xf32> to vector<8x16xf32>
    %312 = math.tanh %311 : vector<8x16xf32>
    %313 = vector.extract_strided_slice %310 {offsets = [0, 0], sizes = [8, 16], strides = [1, 1]} : vector<8x64xf32> to vector<8x16xf32>
    %314 = vector.extract_strided_slice %310 {offsets = [0, 16], sizes = [8, 16], strides = [1, 1]} : vector<8x64xf32> to vector<8x16xf32>
    %315 = vector.extract_strided_slice %310 {offsets = [0, 48], sizes = [8, 16], strides = [1, 1]} : vector<8x64xf32> to vector<8x16xf32>
    %316 = arith.mulf %314, %283 : vector<8x16xf32>
    %317 = arith.mulf %313, %312 : vector<8x16xf32>
    %318 = arith.addf %316, %317 : vector<8x16xf32>
    %319 = math.tanh %318 : vector<8x16xf32>
    %320 = arith.mulf %315, %319 : vector<8x16xf32>
    %c0_99 = arith.constant 0 : index
    %c7 = arith.constant 7 : index
    %321 = memref.load %arg12[%c0_99, %c7] : memref<4x8xf32, #tpu.memory_space<smem>>
    %322 = vector.broadcast %321 : f32 to vector<8x16xf32>
    %323 = arith.mulf %322, %320 : vector<8x16xf32>
    %324 = arith.addf %289, %323 : vector<8x16xf32>
    %c1_100 = arith.constant 1 : index
    %c7_101 = arith.constant 7 : index
    %325 = memref.load %arg12[%c1_100, %c7_101] : memref<4x8xf32, #tpu.memory_space<smem>>
    %326 = vector.broadcast %325 : f32 to vector<8x16xf32>
    %327 = arith.mulf %326, %320 : vector<8x16xf32>
    %328 = arith.addf %293, %327 : vector<8x16xf32>
    %c2_102 = arith.constant 2 : index
    %c7_103 = arith.constant 7 : index
    %329 = memref.load %arg12[%c2_102, %c7_103] : memref<4x8xf32, #tpu.memory_space<smem>>
    %330 = vector.broadcast %329 : f32 to vector<8x16xf32>
    %331 = arith.mulf %330, %320 : vector<8x16xf32>
    %332 = arith.addf %297, %331 : vector<8x16xf32>
    %c3_104 = arith.constant 3 : index
    %c7_105 = arith.constant 7 : index
    %333 = memref.load %arg12[%c3_104, %c7_105] : memref<4x8xf32, #tpu.memory_space<smem>>
    %334 = vector.broadcast %333 : f32 to vector<8x16xf32>
    %335 = arith.mulf %334, %320 : vector<8x16xf32>
    %336 = arith.addf %301, %335 : vector<8x16xf32>
    %337 = vector.shape_cast %324 : vector<8x16xf32> to vector<1x8x16xf32>
    %338 = vector.shape_cast %328 : vector<8x16xf32> to vector<1x8x16xf32>
    %339 = vector.shape_cast %332 : vector<8x16xf32> to vector<1x8x16xf32>
    %340 = vector.shape_cast %336 : vector<8x16xf32> to vector<1x8x16xf32>
    %341 = tpu.concatenate %337, %338, %339, %340 in 0 : vector<1x8x16xf32>, vector<1x8x16xf32>, vector<1x8x16xf32>, vector<1x8x16xf32> -> vector<4x8x16xf32>
    %342 = vector.shape_cast %341 : vector<4x8x16xf32> to vector<32x16xf32>
    %c0_106 = arith.constant 0 : index
    %c0_107 = arith.constant 0 : index
    %343 = vector.load %arg13[%c0_106, %c0_107] : memref<16x16xf32, #tpu.memory_space<vmem>>, vector<16x16xf32>
    %cst_108 = arith.constant dense<0.000000e+00> : vector<32x16xf32>
    %344 = tpu.matmul %342, %343, %cst_108 {dimension_numbers = #tpu.dot_dimension_numbers<[1], [0], [0], [1], [0, 0, 1, 1], [], []>} : vector<32x16xf32>, vector<16x16xf32>, vector<32x16xf32> -> vector<32x16xf32>
    %c0_109 = arith.constant 0 : index
    %c0_110 = arith.constant 0 : index
    %345 = vector.load %arg11[%c0_109, %c0_110] : memref<4x8xf32, #tpu.memory_space<vmem>>, vector<4x8xf32>
    %cst_111 = arith.constant dense<0.000000e+00> : vector<4x128xf32>
    %346 = tpu.matmul %345, %42, %cst_111 {dimension_numbers = #tpu.dot_dimension_numbers<[1], [0], [0], [1], [0, 0, 1, 1], [], []>} : vector<4x8xf32>, vector<8x128xf32>, vector<4x128xf32> -> vector<4x128xf32>
    %c0_112 = arith.constant 0 : index
    %c0_113 = arith.constant 0 : index
    %347 = vector.load %arg14[%c0_112, %c0_113] : memref<128x128xf32, #tpu.memory_space<vmem>>, vector<128x128xf32>
    %cst_114 = arith.constant dense<0.000000e+00> : vector<4x128xf32>
    %348 = tpu.matmul %346, %347, %cst_114 {dimension_numbers = #tpu.dot_dimension_numbers<[1], [0], [0], [1], [0, 0, 1, 1], [], []>} : vector<4x128xf32>, vector<128x128xf32>, vector<4x128xf32> -> vector<4x128xf32>
    %349 = vector.extract_strided_slice %348 {offsets = [0, 0], sizes = [4, 16], strides = [1, 1]} : vector<4x128xf32> to vector<4x16xf32>
    %350 = vector.shape_cast %349 : vector<4x16xf32> to vector<4x1x16xf32>
    %c0_115 = arith.constant 0 : index
    %c0_116 = arith.constant 0 : index
    %c0_117 = arith.constant 0 : index
    %351 = vector.load %arg16[%c0_115, %c0_116, %c0_117] : memref<4x8x16xf32, #tpu.memory_space<vmem>>, vector<4x1x16xf32>
    tpu.vector_store %arg16[%c0_115, %c0_116, %c0_117], %350 {strides = array<i32>} : memref<4x8x16xf32, #tpu.memory_space<vmem>>, vector<4x1x16xf32>,
    %352 = vector.extract_strided_slice %348 {offsets = [0, 16], sizes = [4, 16], strides = [1, 1]} : vector<4x128xf32> to vector<4x16xf32>
    %353 = vector.shape_cast %352 : vector<4x16xf32> to vector<4x1x16xf32>
    %c0_118 = arith.constant 0 : index
    %c1_119 = arith.constant 1 : index
    %c0_120 = arith.constant 0 : index
    %354 = vector.load %arg16[%c0_118, %c1_119, %c0_120] : memref<4x8x16xf32, #tpu.memory_space<vmem>>, vector<4x1x16xf32>
    tpu.vector_store %arg16[%c0_118, %c1_119, %c0_120], %353 {strides = array<i32>} : memref<4x8x16xf32, #tpu.memory_space<vmem>>, vector<4x1x16xf32>,
    %355 = vector.extract_strided_slice %348 {offsets = [0, 32], sizes = [4, 16], strides = [1, 1]} : vector<4x128xf32> to vector<4x16xf32>
    %356 = vector.shape_cast %355 : vector<4x16xf32> to vector<4x1x16xf32>
    %c0_121 = arith.constant 0 : index
    %c2_122 = arith.constant 2 : index
    %c0_123 = arith.constant 0 : index
    %357 = vector.load %arg16[%c0_121, %c2_122, %c0_123] : memref<4x8x16xf32, #tpu.memory_space<vmem>>, vector<4x1x16xf32>
    tpu.vector_store %arg16[%c0_121, %c2_122, %c0_123], %356 {strides = array<i32>} : memref<4x8x16xf32, #tpu.memory_space<vmem>>, vector<4x1x16xf32>,
    %358 = vector.extract_strided_slice %348 {offsets = [0, 48], sizes = [4, 16], strides = [1, 1]} : vector<4x128xf32> to vector<4x16xf32>
    %359 = vector.shape_cast %358 : vector<4x16xf32> to vector<4x1x16xf32>
    %c0_124 = arith.constant 0 : index
    %c3_125 = arith.constant 3 : index
    %c0_126 = arith.constant 0 : index
    %360 = vector.load %arg16[%c0_124, %c3_125, %c0_126] : memref<4x8x16xf32, #tpu.memory_space<vmem>>, vector<4x1x16xf32>
    tpu.vector_store %arg16[%c0_124, %c3_125, %c0_126], %359 {strides = array<i32>} : memref<4x8x16xf32, #tpu.memory_space<vmem>>, vector<4x1x16xf32>,
    %361 = vector.extract_strided_slice %348 {offsets = [0, 64], sizes = [4, 16], strides = [1, 1]} : vector<4x128xf32> to vector<4x16xf32>
    %362 = vector.shape_cast %361 : vector<4x16xf32> to vector<4x1x16xf32>
    %c0_127 = arith.constant 0 : index
    %c4_128 = arith.constant 4 : index
    %c0_129 = arith.constant 0 : index
    %363 = vector.load %arg16[%c0_127, %c4_128, %c0_129] : memref<4x8x16xf32, #tpu.memory_space<vmem>>, vector<4x1x16xf32>
    tpu.vector_store %arg16[%c0_127, %c4_128, %c0_129], %362 {strides = array<i32>} : memref<4x8x16xf32, #tpu.memory_space<vmem>>, vector<4x1x16xf32>,
    %364 = vector.extract_strided_slice %348 {offsets = [0, 80], sizes = [4, 16], strides = [1, 1]} : vector<4x128xf32> to vector<4x16xf32>
    %365 = vector.shape_cast %364 : vector<4x16xf32> to vector<4x1x16xf32>
    %c0_130 = arith.constant 0 : index
    %c5_131 = arith.constant 5 : index
    %c0_132 = arith.constant 0 : index
    %366 = vector.load %arg16[%c0_130, %c5_131, %c0_132] : memref<4x8x16xf32, #tpu.memory_space<vmem>>, vector<4x1x16xf32>
    tpu.vector_store %arg16[%c0_130, %c5_131, %c0_132], %365 {strides = array<i32>} : memref<4x8x16xf32, #tpu.memory_space<vmem>>, vector<4x1x16xf32>,
    %367 = vector.extract_strided_slice %348 {offsets = [0, 96], sizes = [4, 16], strides = [1, 1]} : vector<4x128xf32> to vector<4x16xf32>
    %368 = vector.shape_cast %367 : vector<4x16xf32> to vector<4x1x16xf32>
    %c0_133 = arith.constant 0 : index
    %c6_134 = arith.constant 6 : index
    %c0_135 = arith.constant 0 : index
    %369 = vector.load %arg16[%c0_133, %c6_134, %c0_135] : memref<4x8x16xf32, #tpu.memory_space<vmem>>, vector<4x1x16xf32>
    tpu.vector_store %arg16[%c0_133, %c6_134, %c0_135], %368 {strides = array<i32>} : memref<4x8x16xf32, #tpu.memory_space<vmem>>, vector<4x1x16xf32>,
    %370 = vector.extract_strided_slice %348 {offsets = [0, 112], sizes = [4, 16], strides = [1, 1]} : vector<4x128xf32> to vector<4x16xf32>
    %371 = vector.shape_cast %370 : vector<4x16xf32> to vector<4x1x16xf32>
    %c0_136 = arith.constant 0 : index
    %c7_137 = arith.constant 7 : index
    %c0_138 = arith.constant 0 : index
    %372 = vector.load %arg16[%c0_136, %c7_137, %c0_138] : memref<4x8x16xf32, #tpu.memory_space<vmem>>, vector<4x1x16xf32>
    tpu.vector_store %arg16[%c0_136, %c7_137, %c0_138], %371 {strides = array<i32>} : memref<4x8x16xf32, #tpu.memory_space<vmem>>, vector<4x1x16xf32>,
    %c0_139 = arith.constant 0 : index
    %c0_140 = arith.constant 0 : index
    %c0_141 = arith.constant 0 : index
    %373 = vector.load %arg16[%c0_139, %c0_140, %c0_141] : memref<4x8x16xf32, #tpu.memory_space<vmem>>, vector<4x8x16xf32>
    %374 = vector.shape_cast %344 : vector<32x16xf32> to vector<4x8x16xf32>
    %375 = arith.addf %373, %374 : vector<4x8x16xf32>
    %c0_142 = arith.constant 0 : index
    %c0_143 = arith.constant 0 : index
    %376 = vector.load %arg15[%c0_142, %c0_143] : memref<4x16xf32, #tpu.memory_space<vmem>>, vector<4x16xf32>
    %377 = vector.shape_cast %376 : vector<4x16xf32> to vector<4x1x16xf32>
    %378 = vector.broadcast %377 : vector<4x1x16xf32> to vector<4x8x16xf32>
    %379 = arith.addf %375, %378 : vector<4x8x16xf32>
    %c0_144 = arith.constant 0 : index
    %c0_145 = arith.constant 0 : index
    %c0_146 = arith.constant 0 : index
    %380 = vector.load %arg16[%c0_144, %c0_145, %c0_146] : memref<4x8x16xf32, #tpu.memory_space<vmem>>, vector<4x8x16xf32>
    tpu.vector_store %arg16[%c0_144, %c0_145, %c0_146], %379 {strides = array<i32>} : memref<4x8x16xf32, #tpu.memory_space<vmem>>, vector<4x8x16xf32>,
    return
  }
}

</mosaic_0001>

<bundles_post_ra>
// kernel: tpu_custom_call.1
= control target key start
LH: loop header
LB: loop body
LE: loop exit
PB: predicated region body
PF: predicated region fallthrough
CT: control target
= control target key end

     0   :  { %s3189_s0 = inlined_call_operand.vmem [shape: f32[8,128], index: 0, kind: input, shape index: {}]   ;;  %s3190_s1 = inlined_call_operand.vmem [shape: f32[64,16], index: 1, kind: input, shape index: {}]   ;;  %s3191_s2 = inlined_call_operand.hbm [shape: f32[8,24], index: 2, kind: input, shape index: {}]   ;;  %s3192_s3 = inlined_call_operand.vmem [shape: f32[8,1], index: 3, kind: input, shape index: {}]   ;;  %s3193_s4 = inlined_call_operand.hbm [shape: f32[8,24], index: 4, kind: input, shape index: {}]   ;;  %s3194_s5 = inlined_call_operand.vmem [shape: f32[8,1], index: 5, kind: input, shape index: {}]   ;;  %s3195_s6 = inlined_call_operand.hbm [shape: f32[8,24], index: 6, kind: input, shape index: {}]   ;;  %s3196_s7 = inlined_call_operand.vmem [shape: f32[8,1], index: 7, kind: input, shape index: {}]   ;;  %s3197_s8 = inlined_call_operand.vmem [shape: f32[16,64], index: 8, kind: input, shape index: {}]   ;;  %s3198_s9 = inlined_call_operand.hbm [shape: f32[16,64], index: 9, kind: input, shape index: {}]   ;;  %s3199_s10 = inlined_call_operand.hbm [shape: f32[1,64], index: 10, kind: input, shape index: {}]   ;;  %s3200_s11 = inlined_call_operand.vmem [shape: f32[4,8], index: 11, kind: input, shape index: {}]   ;;  %s3201_s12 = inlined_call_operand.vmem [shape: f32[4,8], index: 12, kind: input, shape index: {}]   ;;  %s3202_s13 = inlined_call_operand.hbm [shape: f32[16,16], index: 13, kind: input, shape index: {}]   ;;  %s3203_s14 = inlined_call_operand.vmem [shape: f32[128,128], index: 14, kind: input, shape index: {}]   ;;  %s3204_s15 = inlined_call_operand.hbm [shape: f32[4,16], index: 15, kind: input, shape index: {}]   ;;  %s3205_s16 = inlined_call_operand.hbm [shape: f32[4,8,16], index: 16, kind: output, shape index: {}]  }
   0x1   :  { %3206 = sst [smem:[#allocation23_spill]] %s3189_s0 }
   0x2   :  { %21 = vsyncpa [#allocation3], 0 }
   0x3   :  { %22 = vsyncpa [#allocation7], 0 }
   0x4   :  { %23 = vsyncpa [#allocation10], 0 }
   0x5   :  { %24 = vsyncpa [#allocation5], 0 }
   0x6   :  { %25 = vsyncpa [#allocation14], 0 }
   0x7   :  { %26 = vsyncpa [#allocation4], 0  ;;  %s2646_s21 = smov [#allocation6]   ;;  %s2647_s23 = smov [#allocation9]  }
   0x8   :  { %s49_s22 = sshll.u32 %s2646_s21, 4  ;;  %s74_s24 = sshll.u32 %s2647_s23, 4  ;;  %s50_s22 = int_to_ptr.vmem [resolvable:$true] %s49_s22  ;;  %s2756_s24 = int_to_ptr.vmem [resolvable:$true] %s74_s24 }
   0x9   :  { %s2446_s27 = scalar_lea.hbm %s3193_s4, 128 }
   0xa   :  { %p2447_p0 = scmp.ne.s32.totalorder %s3193_s4, %s2446_s27  ;;  %p2450_p1 = scmp.lt.u32.totalorder %s2446_s27, %s3193_s4 }
   0xc   :  { %p2452_p2 = pnand %p2450_p1, %p2447_p0 }
   0xe   :  { %2455 = shalt.err (!%p2452_p2)
}
   0xf   :  { %s2456_s17 = scalar_lea.vmem %s50_s22, 128  ;;  %p2461_p4 = scmp.lt.s32.totalorder %s50_s22, %s50_s22 }
  0x10   :  { %p2457_p3 = scmp.ne.s32.totalorder %s50_s22, %s2456_s17  ;;  %p2462_p5 = scmp.lt.s32.totalorder %s2456_s17, %s2456_s17 }
  0x12   :  { %p2463_p6 = por %p2462_p5, %p2461_p4 }
  0x14   :  { %p2464_p7 = pnand %p2463_p6, %p2457_p3 }
  0x16   :  { %2467 = shalt.err (!%p2464_p7)
}
  0x17   :  { %52 = dma.hbm_to_vmem [thread:$0]  %s3193_s4, 128, %s50_s22, [#allocation7]  }
  0x18   :  { %s2468_s23 = scalar_lea.hbm %s3198_s9, 256 }
  0x19   :  { %p2469_p8 = scmp.ne.s32.totalorder %s3198_s9, %s2468_s23  ;;  %p2472_p9 = scmp.lt.u32.totalorder %s2468_s23, %s3198_s9 }
  0x1b   :  { %p2474_p10 = pnand %p2472_p9, %p2469_p8 }
  0x1d   :  { %2477 = shalt.err (!%p2474_p10)
}
  0x1e   :  { %s2478_s29 = scalar_lea.vmem %s2756_s24, 256  ;;  %p2483_p12 = scmp.lt.s32.totalorder %s2756_s24, %s2756_s24 }
  0x1f   :  { %p2479_p11 = scmp.ne.s32.totalorder %s2756_s24, %s2478_s29  ;;  %p2484_p13 = scmp.lt.s32.totalorder %s2478_s29, %s2478_s29 }
  0x21   :  { %p2485_p0 = por %p2484_p13, %p2483_p12 }
  0x23   :  { %p2486_p1 = pnand %p2485_p0, %p2479_p11 }
  0x25   :  { %2489 = shalt.err (!%p2486_p1)
}
  0x26   :  { %s2648_s4 = smov 128   ;;  %s2649_s22 = smov 8  }
  0x27   :  { %80 = dma.hbm_to_vmem [thread:$0]  %s3198_s9, 256, %s2756_s24, [#allocation10], %s2648_s4, %s2648_s4, %s2649_s22  }
  0x28   :  { %s2650_s17 = smov [#allocation13]   ;;  %s2651_s19 = smov [#allocation2]  }
  0x29   :  { %s108_s18 = sshll.u32 %s2650_s17, 4  ;;  %s37_s20 = sshll.u32 %s2651_s19, 4  ;;  %s109_s18 = int_to_ptr.vmem [resolvable:$true] %s108_s18  ;;  %s38_s20 = int_to_ptr.vmem [resolvable:$true] %s37_s20 }
  0x2a   :  { %s2490_s25 = scalar_lea.hbm %s3202_s13, 256 }
  0x2b   :  { %p2491_p2 = scmp.ne.s32.totalorder %s3202_s13, %s2490_s25  ;;  %p2494_p3 = scmp.lt.u32.totalorder %s2490_s25, %s3202_s13 }
  0x2d   :  { %p2496_p4 = pnand %p2494_p3, %p2491_p2 }
  0x2f   :  { %2499 = shalt.err (!%p2496_p4)
}
  0x30   :  { %s2500_s9 = scalar_lea.vmem %s109_s18, 256  ;;  %p2505_p6 = scmp.lt.s32.totalorder %s109_s18, %s109_s18 }
  0x31   :  { %p2501_p5 = scmp.ne.s32.totalorder %s109_s18, %s2500_s9  ;;  %p2506_p7 = scmp.lt.s32.totalorder %s2500_s9, %s2500_s9 }
  0x33   :  { %p2507_p8 = por %p2506_p7, %p2505_p6 }
  0x35   :  { %p2508_p9 = pnand %p2507_p8, %p2501_p5 }
  0x37   :  { %2511 = shalt.err (!%p2508_p9)
}
  0x38   :  { %114 = dma.hbm_to_vmem [thread:$0]  %s3202_s13, 256, %s109_s18, [#allocation14], %s2648_s4, %s2648_s4, %s2649_s22  }
  0x39   :  { %s2512_s19 = scalar_lea.hbm %s3191_s2, 128 }
  0x3a   :  { %p2513_p10 = scmp.ne.s32.totalorder %s3191_s2, %s2512_s19  ;;  %p2516_p11 = scmp.lt.u32.totalorder %s2512_s19, %s3191_s2 }
  0x3c   :  { %p2518_p12 = pnand %p2516_p11, %p2513_p10 }
  0x3e   :  { %2521 = shalt.err (!%p2518_p12)
}
  0x3f   :  { %s2522_s27 = scalar_lea.vmem %s38_s20, 128  ;;  %p2527_p0 = scmp.lt.s32.totalorder %s38_s20, %s38_s20 }
  0x40   :  { %p2523_p13 = scmp.ne.s32.totalorder %s38_s20, %s2522_s27  ;;  %p2528_p1 = scmp.lt.s32.totalorder %s2522_s27, %s2522_s27 }
  0x42   :  { %p2529_p2 = por %p2528_p1, %p2527_p0 }
  0x44   :  { %p2530_p3 = pnand %p2529_p2, %p2523_p13 }
  0x46   :  { %2533 = shalt.err (!%p2530_p3)
}
  0x47   :  { %40 = dma.hbm_to_vmem [thread:$0]  %s3191_s2, 128, %s38_s20, [#allocation3]  }
  0x48   :  { %s2652_s28 = smov [#allocation8]   ;;  %s2653_s9 = smov [#allocation11]  }
  0x49   :  { %s61_s29 = sshll.u32 %s2652_s28, 4  ;;  %s87_s24 = sshll.u32 %s2653_s9, 4  ;;  %s62_s29 = int_to_ptr.vmem [resolvable:$true] %s61_s29  ;;  %s88_s24 = int_to_ptr.vmem [resolvable:$true] %s87_s24 }
  0x4a   :  { %s2534_s17 = scalar_lea.hbm %s3195_s6, 128 }
  0x4b   :  { %p2535_p4 = scmp.ne.s32.totalorder %s3195_s6, %s2534_s17  ;;  %p2538_p5 = scmp.lt.u32.totalorder %s2534_s17, %s3195_s6 }
  0x4d   :  { %p2540_p6 = pnand %p2538_p5, %p2535_p4 }
  0x4f   :  { %2543 = shalt.err (!%p2540_p6)
}
  0x50   :  { %s2544_s2 = scalar_lea.vmem %s62_s29, 128  ;;  %p2549_p8 = scmp.lt.s32.totalorder %s62_s29, %s62_s29 }
  0x51   :  { %p2545_p7 = scmp.ne.s32.totalorder %s62_s29, %s2544_s2  ;;  %p2550_p9 = scmp.lt.s32.totalorder %s2544_s2, %s2544_s2 }
  0x53   :  { %p2551_p10 = por %p2550_p9, %p2549_p8 }
  0x55   :  { %p2552_p11 = pnand %p2551_p10, %p2545_p7 }
  0x57   :  { %2555 = shalt.err (!%p2552_p11)
}
  0x58   :  { %64 = dma.hbm_to_vmem [thread:$0]  %s3195_s6, 128, %s62_s29, [#allocation7]  }
  0x59   :  { %s2556_s18 = scalar_lea.hbm %s3199_s10, 16 }
  0x5a   :  { %p2557_p12 = scmp.ne.s32.totalorder %s3199_s10, %s2556_s18  ;;  %p2560_p13 = scmp.lt.u32.totalorder %s2556_s18, %s3199_s10 }
  0x5c   :  { %p2562_p0 = pnand %p2560_p13, %p2557_p12 }
  0x5e   :  { %2565 = shalt.err (!%p2562_p0)
}
  0x5f   :  { %s2566_s17 = scalar_lea.vmem %s88_s24, 16  ;;  %s2570_s19 = scalar_lea.vmem %s88_s24, 32 }
  0x60   :  { %p2567_p1 = scmp.ne.s32.totalorder %s88_s24, %s2566_s17  ;;  %p2571_p2 = scmp.lt.s32.totalorder %s88_s24, %s88_s24 }
  0x61   :  { %p2572_p3 = scmp.lt.s32.totalorder %s2570_s19, %s2566_s17 }
  0x63   :  { %p2573_p4 = por %p2572_p3, %p2571_p2 }
  0x65   :  { %p2574_p5 = pnand %p2573_p4, %p2567_p1 }
  0x67   :  { %2577 = shalt.err (!%p2574_p5)
}
  0x68   :  { %90 = dma.hbm_to_vmem [thread:$0]  %s3199_s10, 16, %s88_s24, [#allocation10]  }
  0x69   :  { %s99_s25 = sshll.u32 %s3201_s12, 4  ;;  %s100_s25 = int_to_ptr.vmem [resolvable:$true] %s99_s25 }
  0x6a   :  { %s2578_s2 = scalar_lea.vmem %s100_s25, 64  ;;  %p2583_p7 = scmp.lt.s32.totalorder %s100_s25, %s100_s25 }
  0x6b   :  { %p2579_p6 = scmp.ne.s32.totalorder %s100_s25, %s2578_s2  ;;  %p2584_p8 = scmp.lt.s32.totalorder %s2578_s2, %s2578_s2 }
  0x6d   :  { %p2585_p9 = por %p2584_p8, %p2583_p7 }
  0x6f   :  { %p2586_p10 = pnand %p2585_p9, %p2579_p6 }
  0x71   :  { %2589 = shalt.err (!%p2586_p10)
}
  0x72   :  { %s2654_s20 = smov [#allocation12]   ;;  %s2655_s26 = smov [#allocation15]  }
  0x73   :  { %102 = dma.vmem_to_smem %s100_s25, 64, %s2654_s20, [#allocation5]  }
  0x74   :  { %s123_s27 = sshll.u32 %s2655_s26, 4  ;;  %s2590_s10 = scalar_lea.hbm %s3204_s15, 64  ;;  %s124_s27 = int_to_ptr.vmem [resolvable:$true] %s123_s27 }
  0x75   :  { %p2591_p11 = scmp.ne.s32.totalorder %s3204_s15, %s2590_s10  ;;  %p2594_p12 = scmp.lt.u32.totalorder %s2590_s10, %s3204_s15 }
  0x77   :  { %p2596_p13 = pnand %p2594_p12, %p2591_p11 }
  0x79   :  { %2599 = shalt.err (!%p2596_p13)
}
  0x7a   :  { %s2600_s30 = scalar_lea.vmem %s124_s27, 64  ;;  %p2605_p1 = scmp.lt.s32.totalorder %s124_s27, %s124_s27 }
  0x7b   :  { %p2601_p0 = scmp.ne.s32.totalorder %s124_s27, %s2600_s30  ;;  %p2606_p2 = scmp.lt.s32.totalorder %s2600_s30, %s2600_s30 }
  0x7d   :  { %p2607_p3 = por %p2606_p2, %p2605_p1 }
  0x7f   :  { %p2608_p4 = pnand %p2607_p3, %p2601_p0 }
  0x81   :  { %2611 = shalt.err (!%p2608_p4)
}
  0x82   :  { %126 = dma.hbm_to_vmem [thread:$0]  %s3204_s15, 64, %s124_s27, [#allocation14]  }
  0x83   :  { %2634 = dma.done.wait [#allocation3], 128  }
  0x84   :  { %2635 = vsyncadd [#allocation3], 4294967168 }
  0x85   :  { %2636 = dma.done.wait [#allocation7], 256  }
  0x86   :  { %2637 = vsyncadd [#allocation7], 4294967040 }
  0x87   :  { %2638 = dma.done.wait [#allocation10], 272  }
  0x88   :  { %2639 = vsyncadd [#allocation10], 4294967024 }
  0x89   :  { %2640 = dma.done.wait [#allocation5], 64  }
  0x8a   :  { %2641 = vsyncadd [#allocation5], 4294967232 }
  0x8b   :  { %2642 = dma.done.wait [#allocation14], 320  }
  0x8c   :  { %2643 = vsyncadd [#allocation14], 4294966976 }
  0x8d   :  { %151 = sfence }
  0x8e   :  { %s3207_s29 = sld [smem:[#allocation23_spill]]  ;;  %s2656_s21 = smov 127   ;;  %v2657_v1 = vmov 0.0|0.0   ;;  %v161_v2 = vld [vmem:[%s3192_s3] sm:$0xff]  ;;  %vm2658_vm0 = vmmov 0   ;;  %v2659_v3 = vmov 0.0  }
  0x8f   :  { %2290 = vmatprep.subr.bf16.mxu1 %v2657_v1  ;;  %2147 = vmatprep.mubr.msk.f32.mxu1 %vm2658_vm0, %v2659_v3  ;;  %v2660_v4 = vmov 0   ;;  %s2661_s25 = smov 126   ;;  %v160_v8 = vld [vmem:[#allocation2] sm:$0xff]  ;;  %vm167_vm1 = vcmask 195584   ;;  %v249_v17 = vld [vmem:[#allocation6] sm:$0xff]  ;;  %v565_v24 = vld [vmem:[#allocation9] sm:$0xff] }
  0x90   :  { %2380 = vset.pattern.permute.xlu1 %v2660_v4  ;;  %2306 = vmatprep.subr.bf16.mxu0 %v2657_v1  ;;  %v250_v14 = vld [vmem:[%s3194_s5] sm:$0xff]  ;;  %v427_v30 = vld [vmem:[%s3197_s8 + $0x8] sm:$0xff]  ;;  %v337_v32 = vld [vmem:[#allocation8] sm:$0xff]  ;;  %vm435_vm2 = vcmask 130048   ;;  %s2663_s23 = smov 16   ;;  %s2665_s3 = smov 80  }
  0x91   :  { %164 = vperm.xlu1 %2380, %v161_v2   ;;  %2195 = vmatprep.mubr.msk.f32.mxu0 %vm2658_vm0, %v2659_v3  ;;  %v566_v25 = vld [vmem:[#allocation9 + $0x8] sm:$0xff]  ;;  %v419_v35 = vld [vmem:[%s3190_s1 + $0x8] sm:$0xff]  ;;  %v420_v36 = vld [vmem:[%s3190_s1 + $0x10] sm:$0xff]  ;;  %s665_s2 = sld [smem:[#allocation12]]  ;;  %s2024_s27 = sld [smem:[#allocation12 + $0x1]]  ;;  %vm1601_vm3 = vcmask 64512  }
  0x92   :  { %2381 = vset.pattern.permute.xlu0 %v2660_v4  ;;  %v2885_v26 = vpack.c.bf16 %v566_v25, %v565_v24  ;;  %v426_v29 = vld [vmem:[%s3197_s8] sm:$0xff]  ;;  %v421_v37 = vld [vmem:[%s3190_s1 + $0x18] sm:$0xff]  ;;  %v423_v39 = vld [vmem:[%s3190_s1 + $0x28] sm:$0xff]  ;;  %s2019_s5 = sld [smem:[#allocation12 + $0x80]]  ;;  %s2025_s13 = sld [smem:[#allocation12 + $0x81]]  ;;  %vm1790_vm4 = vcmask 122880  }
  0x93   :  { %v2299_v31 = vpack.c.bf16 %v427_v30, %v426_v29  ;;  %v418_v34 = vld [vmem:[%s3190_s1] sm:$0xff]  ;;  %v424_v40 = vld [vmem:[%s3190_s1 + $0x30] sm:$0xff]  ;;  %v425_v41 = vld [vmem:[%s3190_s1 + $0x38] sm:$0xff]  ;;  %s2020_s20 = sld [smem:[#allocation12 + $0x100]]  ;;  %s2026_s18 = sld [smem:[#allocation12 + $0x101]] }
  0x94   :  { %v152_v0 = vld [vmem:[%s3207_s29] sm:$0xff]  ;;  %2308 = vmatpush3.bf16.msra.mxu0 %v2885_v26  ;;  %v2009_v44 = vld [vmem:[#allocation11] ss:$0 sm:$0xff]  ;;  %s2021_s26 = sld [smem:[#allocation12 + $0x180]]  ;;  %s2027_s10 = sld [smem:[#allocation12 + $0x181]] }
  0x95   :  { %154 = vrot.lane.b32.xlu0 %v152_v0, %s2656_s21  ;;  %2309 = vmatprep.subr.bf16.mxu0 %v2657_v1  ;;  %v422_v38 = vld [vmem:[%s3190_s1 + $0x20] sm:$0xff]  ;;  %s2662_s1 = smov 96   ;;  %s2030_s8 = sld [smem:[#allocation12 + $0x2]] }
  0x96   :  { %s2031_s24 = sld [smem:[#allocation12 + $0x82]]  ;;  %s2036_s9 = sld [smem:[#allocation12 + $0x3]] }
  0x97   :  { %s2032_s28 = sld [smem:[#allocation12 + $0x102]]  ;;  %s2037_s30 = sld [smem:[#allocation12 + $0x83]] }
  0x98   :  { %s2033_s12 = sld [smem:[#allocation12 + $0x182]]  ;;  %s2038_s0 = sld [smem:[#allocation12 + $0x103]] }
  0x99   :  { %157 = vrot.lane.b32.xlu0 %v152_v0, %s2661_s25  ;;  %s2039_s17 = sld [smem:[#allocation12 + $0x183]]  ;;  %s2043_s19 = sld [smem:[#allocation12 + $0x84]] }
  0x9a   :  { %s2042_s6 = sld [smem:[#allocation12 + $0x4]]  ;;  %s2049_s15 = sld [smem:[#allocation12 + $0x85]] }
  0x9b   :  { %s2045_s29 = sld [smem:[#allocation12 + $0x184]] }
 0x107   :  { %v155_v5 = vpop.permute.xlu0 %154 }
 0x108   :  { %v2291_v6 = vpack.c.bf16 %v155_v5, %v152_v0 }
 0x10a   :  { %2292 = vmatpush3.bf16.msra.mxu1 %v2291_v6 }
 0x10b   :  { %2145 = vmatprep.subr.mxu1 %v2659_v3  ;;  %v158_v7 = vpop.permute.xlu0 %157 }
 0x10e   :  { %2146 = vmatpush3.msra.mxu1 %v158_v7 }
 0x10f   :  { %2148 = vmatmul.mubr.msk.f32.vlgmr.msra.gmra.mrb[0].mxu1 %vm167_vm1, %v160_v8  ;;  %2293 = vmatprep.subr.bf16.mxu1 %v2657_v1 }
 0x110   :  { %2156 = vmatprep.mubr.msk.f32.mxu1 %vm2658_vm0, %v2659_v3  ;;  %v165_v9 = vpop.permute.xlu1 %164 }
 0x1e2   :  { %v237_v10 = vpop.f32.mrb[0].mxu1 }
 0x1e3   :  { %v238_v11 = vadd.f32 %v237_v10, %v165_v9  ;;  %v2149_v12 = vpop.f32.mrb[1].mxu1 }
 0x1e5   :  { %v241_v13 = vmax.f32 %v238_v11, 0.0 }
 0x1e7   :  { %246 = vrot.lane.b32.xlu0 %v241_v13, %s2661_s25  ;;  %243 = vrot.lane.b32.xlu1 %v241_v13, %s2656_s21 }
 0x1eb   :  { %253 = vperm.xlu1 %2380, %v250_v14  }
 0x259   :  { %v244_v15 = vpop.permute.xlu1 %243  ;;  %v247_v18 = vpop.permute.xlu0 %246 }
 0x25a   :  { %v2294_v16 = vpack.c.bf16 %v244_v15, %v241_v13 }
 0x25c   :  { %2295 = vmatpush3.bf16.msra.mxu1 %v2294_v16 }
 0x25d   :  { %2154 = vmatprep.subr.mxu1 %v2659_v3 }
 0x260   :  { %2155 = vmatpush3.msra.mxu1 %v247_v18 }
 0x261   :  { %2157 = vmatmul.mubr.msk.f32.vlgmr.msra.gmra.mrb[2].mxu1 %vm167_vm1, %v249_v17  ;;  %2296 = vmatprep.subr.bf16.mxu1 %v2657_v1 }
 0x262   :  { %2165 = vmatprep.mubr.msk.f32.mxu1 %vm2658_vm0, %v2659_v3 }
 0x26a   :  { %v254_v19 = vpop.permute.xlu1 %253 }
 0x334   :  { %v325_v20 = vpop.f32.mrb[2].mxu1 }
 0x335   :  { %v326_v21 = vadd.f32 %v325_v20, %v254_v19  ;;  %v2158_v22 = vpop.f32.mrb[3].mxu1 }
 0x337   :  { %v329_v23 = vmax.f32 %v326_v21, 0.0 }
 0x339   :  { %334 = vrot.lane.b32.xlu1 %v329_v23, %s2661_s25  ;;  %331 = vrot.lane.b32.xlu0 %v329_v23, %s2656_s21  ;;  %s2664_s25 = smov 32   ;;  %s2044_s21 = sld [smem:[#allocation12 + $0x104]] }
 0x3ab   :  { %v332_v27 = vpop.permute.xlu0 %331  ;;  %v335_v33 = vpop.permute.xlu1 %334 }
 0x3ac   :  { %v2297_v28 = vpack.c.bf16 %v332_v27, %v329_v23 }
 0x3ae   :  { %2298 = vmatpush3.bf16.msra.mxu1 %v2297_v28 }
 0x3af   :  { %2163 = vmatprep.subr.mxu1 %v2659_v3 }
 0x3b2   :  { %2164 = vmatpush3.msra.mxu1 %v335_v33  ;;  %v674_v33 = vstv %s2020_s20  ;;  %s2050_s20 = sld [smem:[#allocation12 + $0x105]] }
 0x3b3   :  { %2166 = vmatmul.mubr.msk.f32.vlgmr.msra.gmra.mrb[4].mxu1 %vm167_vm1, %v337_v32  ;;  %2300 = vmatprep.subr.bf16.mxu1 %v2299_v31  ;;  %v670_v32 = vstv %s2019_s5  ;;  %s2051_s5 = sld [smem:[#allocation12 + $0x185]] }
 0x3b4   :  { %2302 = vmatpush3.bf16.msra.mxu1 %v2299_v31  ;;  %2172 = vmatprep.mubr.msk.f32.mxu1 %vm435_vm2, %v418_v34  ;;  %v666_v31 = vstv %s665_s2  ;;  %v678_v34 = vstv %s2021_s26  ;;  %s2048_s2 = sld [smem:[#allocation12 + $0x5]]  ;;  %s2055_s26 = sld [smem:[#allocation12 + $0x86]] }
 0x3b5   :  { %2303 = vmatprep.subr.bf16.mxu1 %v2657_v1 }
 0x3b7   :  { %2173 = vmatmul.mubr.msk.f32.vlgmr.msra.gmra.mrb[6].mxu1 %vm435_vm2, %v419_v35  ;;  %v782_v35 = vstv %s2024_s27  ;;  %s2054_s27 = sld [smem:[#allocation12 + $0x6]] }
 0x3b8   :  { %2305 = vmatpush3.bf16.msra.mxu1 %v2885_v26  ;;  %2175 = vmatprep.mubr.msk.f32.mxu1 %vm435_vm2, %v420_v36  ;;  %v786_v36 = vstv %s2025_s13  ;;  %s2057_s13 = sld [smem:[#allocation12 + $0x186]] }
 0x3b9   :  { %2312 = vmatprep.subr.bf16.mxu1 %v2657_v1 }
 0x3bb   :  { %2176 = vmatmul.mubr.msk.f32.gmra.mrb[8].mxu1 %vm435_vm2, %v421_v37  ;;  %v790_v37 = vstv %s2026_s18  ;;  %s2056_s18 = sld [smem:[#allocation12 + $0x106]] }
 0x3bc   :  { %2178 = vmatprep.mubr.msk.f32.mxu1 %vm435_vm2, %v422_v38  ;;  %v794_v38 = vstv %s2027_s10 }
 0x3bf   :  { %2179 = vmatmul.mubr.msk.f32.gmra.mrb[10].mxu1 %vm435_vm2, %v423_v39 }
 0x3c0   :  { %2181 = vmatprep.mubr.msk.f32.mxu1 %vm435_vm2, %v424_v40 }
 0x3c3   :  { %2182 = vmatmul.mubr.msk.f32.gmra.mrb[12].mxu1 %vm435_vm2, %v425_v41 }
 0x3c4   :  { %2188 = vmatprep.mubr.msk.f32.mxu1 %vm2658_vm0, %v2659_v3 }
 0x3c7   :  { %2189 = vmatmul.mubr.f32.vlgmr.msra.gmra.mrb[14].mxu1 %v2659_v3 }
 0x3c8   :  { %2314 = vmatpush3.bf16.msra.mxu1 %v2885_v26  ;;  %2209 = vmatprep.mubr.msk.f32.mxu1 %vm2658_vm0, %v2659_v3 }
 0x3c9   :  { %2318 = vmatprep.subr.bf16.mxu1 %v2657_v1 }
 0x486   :  { %v2941_v42 = vpop.f32.mrb[4].mxu1 }
 0x487   :  { %v2167_v43 = vpop.f32.mrb[5].mxu1 }
 0x48a   :  { %v2174_v45 = vpop.f32.mrb[6].mxu1 }
 0x48b   :  { %v532_v46 = vadd.f32 %v2174_v45, %v2009_v44  ;;  %v526_v47 = vpop.f32.mrb[7].mxu1 }
 0x48c   :  { %v527_v60 = vadd.f32 %v2009_v44, %v526_v47 }
 0x48e   :  { %v2177_v48 = vpop.f32.mrb[8].mxu1 }
 0x48f   :  { %v2943_v49 = vadd.f32 %v2177_v48, %v2009_v44  ;;  %v536_v50 = vpop.f32.mrb[9].mxu1 }
 0x490   :  { %v2945_v51 = vadd.f32 %v2009_v44, %v536_v50 }
 0x492   :  { %v2180_v52 = vpop.f32.mrb[10].mxu1 }
 0x493   :  { %v2947_v53 = vadd.f32 %v2180_v52, %v2009_v44  ;;  %v546_v54 = vpop.f32.mrb[11].mxu1 }
 0x494   :  { %v2949_v55 = vadd.f32 %v2009_v44, %v546_v54 }
 0x496   :  { %v2183_v56 = vpop.f32.mrb[12].mxu1 }
 0x497   :  { %v2951_v57 = vadd.f32 %v2183_v56, %v2009_v44  ;;  %v556_v58 = vpop.f32.mrb[13].mxu1 }
 0x498   :  { %v2953_v59 = vadd.f32 %v2009_v44, %v556_v58 }
 0x49a   :  { %v636_v61 = vpop.f32.mrb[14].mxu1 }
 0x49b   :  { %v640_v62 = vadd.f32 %v636_v61, %v527_v60  ;;  %v2190_v63 = vpop.f32.mrb[15].mxu1 }
 0x49d   :  { %2382 = vtanh.f32 %v640_v62  ;;  %v2018_v2 = vmul.f32 -1.442695, %v640_v62 }
 0x49f   :  { %2384 = vpow2.f32 %v2018_v2 }
 0x4a7   :  { %v2383_v0 = vpop.eup %2382 }
 0x4a8   :  { %650 = vrot.lane.b32.xlu0 %v2383_v0, %s2662_s1 }
 0x4a9   :  { %v2385_v4 = vpop.eup %2384 }
 0x4aa   :  { %v644_v5 = vadd.f32 1.0, %v2385_v4 }
 0x4ac   :  { %2386 = vrcp.f32 %v644_v5 }
 0x4b6   :  { %v2387_v6 = vpop.eup %2386 }
 0x4b7   :  { %v648_v9 = vmul.f32 0.0, %v2387_v6 }
 0x51a   :  { %v651_v7 = vpop.permute.xlu0 %650 }
 0x51b   :  { %v653_v8 = vmul.f32 %v2387_v6, %v651_v7 }
 0x51d   :  { %655 = vrot.lane.b32.xlu1 %v653_v8, %s2663_s23 }
 0x58f   :  { %v656_v10 = vpop.permute.xlu1 %655 }
 0x590   :  { %v658_v11 = vadd.f32 %v656_v10, %v648_v9 }
 0x592   :  { %2388 = vtanh.f32 %v658_v11 }
 0x59c   :  { %v2389_v12 = vpop.eup %2388 }
 0x59d   :  { %661 = vrot.lane.b32.xlu0 %v2389_v12, %s2664_s25  ;;  %v898_v12 = vstv %s2030_s8 }
 0x60f   :  { %v662_v13 = vpop.permute.xlu0 %661 }
 0x610   :  { %v664_v14 = vmul.f32 %v2387_v6, %v662_v13  ;;  %v902_v13 = vstv %s2031_s24 }
 0x612   :  { %682 = vrot.lane.b32.xlu1 %v664_v14, %s2665_s3  ;;  %v667_v41 = vmul.f32 %v666_v31, %v664_v14  ;;  %v671_v43 = vmul.f32 %v670_v32, %v664_v14  ;;  %v675_v44 = vmul.f32 %v674_v33, %v664_v14  ;;  %v679_v45 = vmul.f32 %v678_v34, %v664_v14 }
 0x613   :  { %v906_v14 = vstv %s2032_s28  ;;  %s2061_s28 = sld [smem:[#allocation12 + $0x87]] }
 0x684   :  { %v683_v15 = vpop.permute.xlu1 %682 }
 0x685   :  { %2196 = vmatmul.mubr.msk.f32.vlgmr.msra.gmra.mrb[0].mxu0 %vm435_vm2, %v683_v15  ;;  %v910_v15 = vstv %s2033_s12  ;;  %s2060_s12 = sld [smem:[#allocation12 + $0x7]] }
 0x686   :  { %2311 = vmatpush3.bf16.msra.mxu0 %v2885_v26  ;;  %2202 = vmatprep.mubr.msk.f32.mxu0 %vm2658_vm0, %v2659_v3 }
 0x687   :  { %2315 = vmatprep.subr.bf16.mxu0 %v2657_v1 }
 0x758   :  { %v752_v16 = vpop.f32.mrb[0].mxu0 }
 0x759   :  { %v756_v17 = vadd.f32 %v752_v16, %v532_v46  ;;  %v2197_v18 = vpop.f32.mrb[1].mxu0 }
 0x75b   :  { %2390 = vtanh.f32 %v756_v17  ;;  %v2023_v20 = vmul.f32 -1.442695, %v756_v17 }
 0x75d   :  { %2392 = vpow2.f32 %v2023_v20 }
 0x765   :  { %v2391_v19 = vpop.eup %2390 }
 0x766   :  { %766 = vrot.lane.b32.xlu0 %v2391_v19, %s2662_s1 }
 0x767   :  { %v2393_v21 = vpop.eup %2392 }
 0x768   :  { %v760_v22 = vadd.f32 1.0, %v2393_v21 }
 0x76a   :  { %2394 = vrcp.f32 %v760_v22 }
 0x774   :  { %v2395_v23 = vpop.eup %2394 }
 0x775   :  { %v764_v27 = vmul.f32 %v2395_v23, %v658_v11 }
 0x7d8   :  { %v767_v24 = vpop.permute.xlu0 %766 }
 0x7d9   :  { %v769_v25 = vmul.f32 %v2395_v23, %v767_v24 }
 0x7db   :  { %771 = vrot.lane.b32.xlu1 %v769_v25, %s2663_s23 }
 0x84d   :  { %v772_v28 = vpop.permute.xlu1 %771 }
 0x84e   :  { %v774_v29 = vadd.f32 %v772_v28, %v764_v27 }
 0x850   :  { %2396 = vtanh.f32 %v774_v29 }
 0x85a   :  { %v2397_v30 = vpop.eup %2396 }
 0x85b   :  { %777 = vrot.lane.b32.xlu0 %v2397_v30, %s2664_s25 }
 0x8cd   :  { %v778_v39 = vpop.permute.xlu0 %777 }
 0x8ce   :  { %v780_v40 = vmul.f32 %v2395_v23, %v778_v39 }
 0x8d0   :  { %v783_v46 = vmul.f32 %v782_v35, %v780_v40  ;;  %v787_v47 = vmul.f32 %v786_v36, %v780_v40  ;;  %v791_v48 = vmul.f32 %v790_v37, %v780_v40  ;;  %v795_v50 = vmul.f32 %v794_v38, %v780_v40  ;;  %798 = vrot.lane.b32.xlu1 %v780_v40, %s2665_s3 }
 0x8d2   :  { %v784_v52 = vadd.f32 %v783_v46, %v667_v41  ;;  %v788_v54 = vadd.f32 %v787_v47, %v671_v43  ;;  %v792_v56 = vadd.f32 %v791_v48, %v675_v44  ;;  %v796_v58 = vadd.f32 %v795_v50, %v679_v45 }
 0x8d3   :  { %v1014_v41 = vstv %s2036_s9  ;;  %v1018_v43 = vstv %s2037_s30  ;;  %v1022_v44 = vstv %s2038_s0  ;;  %v1026_v45 = vstv %s2039_s17  ;;  %s2063_s9 = sld [smem:[#allocation12 + $0x187]] }
 0x942   :  { %v799_v60 = vpop.permute.xlu1 %798 }
 0x943   :  { %2203 = vmatmul.mubr.msk.f32.vlgmr.msra.gmra.mrb[2].mxu0 %vm435_vm2, %v799_v60 }
 0x944   :  { %2317 = vmatpush3.bf16.msra.mxu0 %v2885_v26  ;;  %2216 = vmatprep.mubr.msk.f32.mxu0 %vm2658_vm0, %v2659_v3 }
 0x945   :  { %2321 = vmatprep.subr.bf16.mxu0 %v2657_v1 }
 0xa16   :  { %v868_v61 = vpop.f32.mrb[2].mxu0 }
 0xa17   :  { %v872_v62 = vadd.f32 %v868_v61, %v2945_v51  ;;  %v2204_v63 = vpop.f32.mrb[3].mxu0 }
 0xa19   :  { %2398 = vtanh.f32 %v872_v62  ;;  %v2029_v2 = vmul.f32 -1.442695, %v872_v62 }
 0xa1b   :  { %2400 = vpow2.f32 %v2029_v2 }
 0xa23   :  { %v2399_v0 = vpop.eup %2398 }
 0xa24   :  { %882 = vrot.lane.b32.xlu0 %v2399_v0, %s2662_s1 }
 0xa25   :  { %v2401_v4 = vpop.eup %2400 }
 0xa26   :  { %v876_v5 = vadd.f32 1.0, %v2401_v4 }
 0xa28   :  { %2402 = vrcp.f32 %v876_v5 }
 0xa32   :  { %v2403_v6 = vpop.eup %2402 }
 0xa33   :  { %v880_v9 = vmul.f32 %v2403_v6, %v774_v29 }
 0xa96   :  { %v883_v7 = vpop.permute.xlu0 %882 }
 0xa97   :  { %v885_v8 = vmul.f32 %v2403_v6, %v883_v7 }
 0xa99   :  { %887 = vrot.lane.b32.xlu1 %v885_v8, %s2663_s23 }
 0xb0b   :  { %v888_v10 = vpop.permute.xlu1 %887 }
 0xb0c   :  { %v890_v11 = vadd.f32 %v888_v10, %v880_v9 }
 0xb0e   :  { %2404 = vtanh.f32 %v890_v11 }
 0xb18   :  { %v2405_v51 = vpop.eup %2404 }
 0xb19   :  { %893 = vrot.lane.b32.xlu0 %v2405_v51, %s2664_s25 }
 0xb8b   :  { %v894_v16 = vpop.permute.xlu0 %893 }
 0xb8c   :  { %v896_v17 = vmul.f32 %v2403_v6, %v894_v16  ;;  %v1142_v16 = vstv %s2045_s29 }
 0xb8e   :  { %v899_v18 = vmul.f32 %v898_v12, %v896_v17  ;;  %v903_v19 = vmul.f32 %v902_v13, %v896_v17  ;;  %v907_v20 = vmul.f32 %v906_v14, %v896_v17  ;;  %v911_v21 = vmul.f32 %v910_v15, %v896_v17  ;;  %914 = vrot.lane.b32.xlu1 %v896_v17, %s2665_s3 }
 0xb8f   :  { %v1134_v14 = vstv %s2043_s19  ;;  %v1130_v15 = vstv %s2042_s6  ;;  %v1138_v17 = vstv %s2044_s21 }
 0xb90   :  { %v904_v22 = vadd.f32 %v903_v19, %v788_v54  ;;  %v900_v23 = vadd.f32 %v899_v18, %v784_v52  ;;  %v912_v24 = vadd.f32 %v911_v21, %v796_v58  ;;  %v908_v25 = vadd.f32 %v907_v20, %v792_v56 }
 0xc00   :  { %v915_v27 = vpop.permute.xlu1 %914 }
 0xc01   :  { %2210 = vmatmul.mubr.msk.f32.vlgmr.msra.gmra.mrb[16].mxu1 %vm435_vm2, %v915_v27 }
 0xc02   :  { %2320 = vmatpush3.bf16.msra.mxu1 %v2885_v26  ;;  %2223 = vmatprep.mubr.msk.f32.mxu1 %vm2658_vm0, %v2659_v3 }
 0xc03   :  { %2324 = vmatprep.subr.bf16.mxu1 %v2657_v1 }
 0xcd4   :  { %v984_v28 = vpop.f32.mrb[16].mxu1 }
 0xcd5   :  { %v988_v29 = vadd.f32 %v984_v28, %v2943_v49  ;;  %v2211_v30 = vpop.f32.mrb[17].mxu1 }
 0xcd7   :  { %2406 = vtanh.f32 %v988_v29  ;;  %v2035_v32 = vmul.f32 -1.442695, %v988_v29 }
 0xcd9   :  { %2408 = vpow2.f32 %v2035_v32 }
 0xce1   :  { %v2407_v31 = vpop.eup %2406 }
 0xce2   :  { %998 = vrot.lane.b32.xlu0 %v2407_v31, %s2662_s1 }
 0xce3   :  { %v2409_v33 = vpop.eup %2408 }
 0xce4   :  { %v992_v34 = vadd.f32 1.0, %v2409_v33 }
 0xce6   :  { %2410 = vrcp.f32 %v992_v34 }
 0xcf0   :  { %v2411_v35 = vpop.eup %2410 }
 0xcf1   :  { %v996_v38 = vmul.f32 %v2411_v35, %v890_v11 }
 0xd54   :  { %v999_v36 = vpop.permute.xlu0 %998 }
 0xd55   :  { %v1001_v37 = vmul.f32 %v2411_v35, %v999_v36 }
 0xd57   :  { %1003 = vrot.lane.b32.xlu1 %v1001_v37, %s2663_s23 }
 0xdc9   :  { %v1004_v39 = vpop.permute.xlu1 %1003 }
 0xdca   :  { %v1006_v40 = vadd.f32 %v1004_v39, %v996_v38 }
 0xdcc   :  { %2412 = vtanh.f32 %v1006_v40 }
 0xdd6   :  { %v2413_v49 = vpop.eup %2412 }
 0xdd7   :  { %1009 = vrot.lane.b32.xlu0 %v2413_v49, %s2664_s25 }
 0xe49   :  { %v1010_v46 = vpop.permute.xlu0 %1009 }
 0xe4a   :  { %v1012_v47 = vmul.f32 %v2411_v35, %v1010_v46 }
 0xe4c   :  { %v1015_v48 = vmul.f32 %v1014_v41, %v1012_v47  ;;  %v1019_v50 = vmul.f32 %v1018_v43, %v1012_v47  ;;  %v1023_v52 = vmul.f32 %v1022_v44, %v1012_v47  ;;  %v1027_v54 = vmul.f32 %v1026_v45, %v1012_v47  ;;  %1030 = vrot.lane.b32.xlu1 %v1012_v47, %s2665_s3 }
 0xe4d   :  { %v1250_v41 = vstv %s2049_s15  ;;  %v1246_v43 = vstv %s2048_s2  ;;  %v1258_v44 = vstv %s2051_s5  ;;  %v1254_v45 = vstv %s2050_s20  ;;  %s2668_s5 = smov 64   ;;  %s2669_s20 = smov 48  }
 0xe4e   :  { %v1020_v56 = vadd.f32 %v1019_v50, %v904_v22  ;;  %v1016_v58 = vadd.f32 %v1015_v48, %v900_v23  ;;  %v1028_v60 = vadd.f32 %v1027_v54, %v912_v24  ;;  %v1024_v61 = vadd.f32 %v1023_v52, %v908_v25 }
 0xebe   :  { %v1031_v62 = vpop.permute.xlu1 %1030 }
 0xebf   :  { %2217 = vmatmul.mubr.msk.f32.vlgmr.msra.gmra.mrb[4].mxu0 %vm435_vm2, %v1031_v62 }
 0xec0   :  { %2323 = vmatpush3.bf16.msra.mxu0 %v2885_v26  ;;  %2230 = vmatprep.mubr.msk.f32.mxu0 %vm2658_vm0, %v2659_v3 }
 0xf92   :  { %v1100_v63 = vpop.f32.mrb[4].mxu0 }
 0xf93   :  { %v1104_v0 = vadd.f32 %v1100_v63, %v2949_v55  ;;  %v2218_v2 = vpop.f32.mrb[5].mxu0 }
 0xf95   :  { %2414 = vtanh.f32 %v1104_v0  ;;  %v2041_v5 = vmul.f32 -1.442695, %v1104_v0 }
 0xf97   :  { %2416 = vpow2.f32 %v2041_v5 }
 0xf9f   :  { %v2415_v4 = vpop.eup %2414 }
 0xfa0   :  { %1114 = vrot.lane.b32.xlu0 %v2415_v4, %s2662_s1 }
 0xfa1   :  { %v2417_v6 = vpop.eup %2416 }
 0xfa2   :  { %v1108_v7 = vadd.f32 1.0, %v2417_v6 }
 0xfa4   :  { %2418 = vrcp.f32 %v1108_v7 }
 0xfae   :  { %v2419_v8 = vpop.eup %2418 }
 0xfaf   :  { %v1112_v11 = vmul.f32 %v2419_v8, %v1006_v40 }
0x1012   :  { %v1115_v9 = vpop.permute.xlu0 %1114 }
0x1013   :  { %v1117_v10 = vmul.f32 %v2419_v8, %v1115_v9 }
0x1015   :  { %1119 = vrot.lane.b32.xlu1 %v1117_v10, %s2663_s23 }
0x1087   :  { %v1120_v51 = vpop.permute.xlu1 %1119 }
0x1088   :  { %v1122_v12 = vadd.f32 %v1120_v51, %v1112_v11 }
0x108a   :  { %2420 = vtanh.f32 %v1122_v12 }
0x1094   :  { %v2421_v55 = vpop.eup %2420 }
0x1095   :  { %1125 = vrot.lane.b32.xlu0 %v2421_v55, %s2664_s25  ;;  %v1366_v55 = vstv %s2055_s26 }
0x1107   :  { %v1126_v13 = vpop.permute.xlu0 %1125 }
0x1108   :  { %v1128_v18 = vmul.f32 %v2419_v8, %v1126_v13  ;;  %v1362_v13 = vstv %s2054_s27 }
0x110a   :  { %1146 = vrot.lane.b32.xlu1 %v1128_v18, %s2665_s3  ;;  %v1135_v19 = vmul.f32 %v1134_v14, %v1128_v18  ;;  %v1131_v20 = vmul.f32 %v1130_v15, %v1128_v18  ;;  %v1143_v21 = vmul.f32 %v1142_v16, %v1128_v18  ;;  %v1139_v22 = vmul.f32 %v1138_v17, %v1128_v18 }
0x110b   :  { %v1374_v14 = vstv %s2057_s13  ;;  %v1370_v15 = vstv %s2056_s18 }
0x110c   :  { %v1136_v23 = vadd.f32 %v1135_v19, %v1020_v56  ;;  %v1132_v24 = vadd.f32 %v1131_v20, %v1016_v58  ;;  %v1144_v25 = vadd.f32 %v1143_v21, %v1028_v60  ;;  %v1140_v27 = vadd.f32 %v1139_v22, %v1024_v61  ;;  %v338_v21 = vld [vmem:[%s3196_s7] sm:$0xff] }
0x117c   :  { %v1147_v28 = vpop.permute.xlu1 %1146 }
0x117d   :  { %2224 = vmatmul.mubr.msk.f32.vlgmr.msra.gmra.mrb[18].mxu1 %vm435_vm2, %v1147_v28 }
0x117e   :  { %2326 = vmatpush3.bf16.msra.mxu1 %v2885_v26  ;;  %2237 = vmatprep.mubr.msk.f32.mxu1 %vm2658_vm0, %v2659_v3 }
0x117f   :  { %2250 = vmatprep.subr.mxu1 %v2659_v3 }
0x1250   :  { %v1216_v29 = vpop.f32.mrb[18].mxu1 }
0x1251   :  { %v1220_v30 = vadd.f32 %v1216_v29, %v2947_v53  ;;  %v2225_v31 = vpop.f32.mrb[19].mxu1 }
0x1253   :  { %2422 = vtanh.f32 %v1220_v30  ;;  %v2047_v33 = vmul.f32 -1.442695, %v1220_v30 }
0x1255   :  { %2424 = vpow2.f32 %v2047_v33 }
0x125d   :  { %v2423_v32 = vpop.eup %2422 }
0x125e   :  { %1230 = vrot.lane.b32.xlu0 %v2423_v32, %s2662_s1 }
0x125f   :  { %v2425_v34 = vpop.eup %2424 }
0x1260   :  { %v1224_v35 = vadd.f32 1.0, %v2425_v34 }
0x1262   :  { %2426 = vrcp.f32 %v1224_v35 }
0x126c   :  { %v2427_v36 = vpop.eup %2426 }
0x126d   :  { %v1228_v38 = vmul.f32 %v2427_v36, %v1122_v12 }
0x12d0   :  { %v1231_v26 = vpop.permute.xlu0 %1230 }
0x12d1   :  { %v1233_v37 = vmul.f32 %v2427_v36, %v1231_v26 }
0x12d3   :  { %1235 = vrot.lane.b32.xlu1 %v1233_v37, %s2663_s23 }
0x1345   :  { %v1236_v39 = vpop.permute.xlu1 %1235 }
0x1346   :  { %v1238_v40 = vadd.f32 %v1236_v39, %v1228_v38 }
0x1348   :  { %2428 = vtanh.f32 %v1238_v40 }
0x1352   :  { %v2429_v53 = vpop.eup %2428 }
0x1353   :  { %1241 = vrot.lane.b32.xlu0 %v2429_v53, %s2664_s25 }
0x13c5   :  { %v1242_v49 = vpop.permute.xlu0 %1241 }
0x13c6   :  { %v1244_v46 = vmul.f32 %v2427_v36, %v1242_v49  ;;  %v1493_v49 = vld [vmem:[#allocation13] sm:$0xff] }
0x13c8   :  { %1262 = vrot.lane.b32.xlu1 %v1244_v46, %s2665_s3  ;;  %v1251_v47 = vmul.f32 %v1250_v41, %v1244_v46  ;;  %v1247_v48 = vmul.f32 %v1246_v43, %v1244_v46  ;;  %v1259_v50 = vmul.f32 %v1258_v44, %v1244_v46  ;;  %v1255_v52 = vmul.f32 %v1254_v45, %v1244_v46  ;;  %v1494_v41 = vld [vmem:[#allocation13 + $0x8] sm:$0xff] }
0x13c9   :  { %v2327_v43 = vpack.c.bf16 %v1494_v41, %v1493_v49  ;;  %v1482_v46 = vstv %s2061_s28 }
0x13ca   :  { %v1252_v54 = vadd.f32 %v1251_v47, %v1136_v23  ;;  %v1248_v56 = vadd.f32 %v1247_v48, %v1132_v24  ;;  %v1260_v58 = vadd.f32 %v1259_v50, %v1144_v25  ;;  %v1256_v60 = vadd.f32 %v1255_v52, %v1140_v27 }
0x13cb   :  { %2328 = vmatprep.subr.bf16.mxu0 %v2327_v43  ;;  %v1478_v47 = vstv %s2060_s12  ;;  %v1490_v50 = vstv %s2063_s9 }
0x143a   :  { %v1263_v61 = vpop.permute.xlu1 %1262 }
0x143b   :  { %2231 = vmatmul.mubr.msk.f32.vlgmr.msra.gmra.mrb[6].mxu0 %vm435_vm2, %v1263_v61 }
0x143c   :  { %2330 = vmatpush3.bf16.msra.mxu0 %v2327_v43 }
0x143d   :  { %2331 = vmatprep.subr.bf16.mxu0 %v2657_v1 }
0x150e   :  { %v1332_v62 = vpop.f32.mrb[6].mxu0 }
0x150f   :  { %v1336_v63 = vadd.f32 %v1332_v62, %v2953_v59  ;;  %v2232_v0 = vpop.f32.mrb[7].mxu0 }
0x1511   :  { %2430 = vtanh.f32 %v1336_v63  ;;  %v2053_v4 = vmul.f32 -1.442695, %v1336_v63 }
0x1513   :  { %2432 = vpow2.f32 %v2053_v4 }
0x151b   :  { %v2431_v2 = vpop.eup %2430 }
0x151c   :  { %1346 = vrot.lane.b32.xlu0 %v2431_v2, %s2662_s1 }
0x151d   :  { %v2433_v5 = vpop.eup %2432 }
0x151e   :  { %v1340_v6 = vadd.f32 1.0, %v2433_v5  ;;  %v1675_v5 = vld [vmem:[%s3203_s14] sm:$0xff] }
0x1520   :  { %2434 = vrcp.f32 %v1340_v6  ;;  %v1676_v6 = vld [vmem:[%s3203_s14 + $0x8] sm:$0xff] }
0x152a   :  { %v2435_v7 = vpop.eup %2434 }
0x152b   :  { %v1344_v10 = vmul.f32 %v2435_v7, %v1238_v40 }
0x158e   :  { %v1347_v8 = vpop.permute.xlu0 %1346 }
0x158f   :  { %v1349_v9 = vmul.f32 %v2435_v7, %v1347_v8 }
0x1591   :  { %1351 = vrot.lane.b32.xlu1 %v1349_v9, %s2663_s23 }
0x1603   :  { %v1352_v11 = vpop.permute.xlu1 %1351 }
0x1604   :  { %v1354_v51 = vadd.f32 %v1352_v11, %v1344_v10  ;;  %v1677_v10 = vld [vmem:[%s3203_s14 + $0x10] sm:$0xff]  ;;  %v1678_v11 = vld [vmem:[%s3203_s14 + $0x18] sm:$0xff] }
0x1606   :  { %2436 = vtanh.f32 %v1354_v51 }
0x1610   :  { %v2437_v59 = vpop.eup %2436 }
0x1611   :  { %1357 = vrot.lane.b32.xlu0 %v2437_v59, %s2664_s25 }
0x1683   :  { %v1358_v12 = vpop.permute.xlu0 %1357 }
0x1684   :  { %v1360_v16 = vmul.f32 %v2435_v7, %v1358_v12  ;;  %v2332_v7 = vpack.c.bf16 %v1676_v6, %v1675_v5 }
0x1686   :  { %1378 = vrot.lane.b32.xlu1 %v1360_v16, %s2665_s3  ;;  %v1367_v17 = vmul.f32 %v1366_v55, %v1360_v16  ;;  %v1363_v18 = vmul.f32 %v1362_v13, %v1360_v16  ;;  %v1375_v19 = vmul.f32 %v1374_v14, %v1360_v16  ;;  %v1371_v20 = vmul.f32 %v1370_v15, %v1360_v16  ;;  %v1679_v55 = vld [vmem:[%s3203_s14 + $0x20] sm:$0xff]  ;;  %v1680_v13 = vld [vmem:[%s3203_s14 + $0x28] sm:$0xff]  ;;  %v1681_v15 = vld [vmem:[%s3203_s14 + $0x30] sm:$0xff] }
0x1687   :  { %v2338_v14 = vpack.c.bf16 %v1680_v13, %v1679_v55  ;;  %v1682_v16 = vld [vmem:[%s3203_s14 + $0x38] sm:$0xff] }
0x1688   :  { %v1368_v22 = vadd.f32 %v1367_v17, %v1252_v54  ;;  %v1364_v23 = vadd.f32 %v1363_v18, %v1248_v56  ;;  %v1376_v24 = vadd.f32 %v1375_v19, %v1260_v58  ;;  %v1372_v25 = vadd.f32 %v1371_v20, %v1256_v60  ;;  %v1683_v18 = vld [vmem:[%s3203_s14 + $0x40] sm:$0xff]  ;;  %v1685_v20 = vld [vmem:[%s3203_s14 + $0x50] sm:$0xff] }
0x1689   :  { %v2341_v17 = vpack.c.bf16 %v1682_v16, %v1681_v15 }
0x168a   :  { %341 = vperm.xlu1 %2380, %v338_v21   ;;  %v1686_v21 = vld [vmem:[%s3203_s14 + $0x58] sm:$0xff] }
0x16f8   :  { %v1379_v27 = vpop.permute.xlu1 %1378 }
0x16f9   :  { %2238 = vmatmul.mubr.msk.f32.vlgmr.msra.gmra.mrb[20].mxu1 %vm435_vm2, %v1379_v27  ;;  %v1689_v27 = vld [vmem:[%s3203_s14 + $0x70] sm:$0xff] }
0x16fa   :  { %2252 = vmatprep.mubr.msk.f32.mxu1 %vm2658_vm0, %v2659_v3 }
0x1709   :  { %v342_v28 = vpop.permute.xlu1 %341 }
0x170a   :  { %v414_v29 = vadd.f32 %v2941_v42, %v342_v28  ;;  %v1600_v42 = vld [vmem:[%s3200_s11] sm:$0xf]  ;;  %s2062_s11 = sld [smem:[#allocation12 + $0x107]]  ;;  %v1690_v28 = vld [vmem:[%s3203_s14 + $0x78] sm:$0xff] }
0x170c   :  { %v417_v30 = vmax.f32 %v414_v29, 0.0  ;;  %v2353_v29 = vpack.c.bf16 %v1690_v28, %v1689_v27 }
0x170e   :  { %2251 = vmatpush3.msra.mxu1 %v417_v30 }
0x170f   :  { %2253 = vmatmul.mubr.msk.f32.vlgmr.msra.gmra.mrb[22].mxu1 %vm1601_vm3, %v1600_v42 }
0x1710   :  { %v1486_v52 = vstv %s2062_s11 }
0x17cc   :  { %v1448_v31 = vpop.f32.mrb[20].mxu1 }
0x17cd   :  { %v1452_v32 = vadd.f32 %v1448_v31, %v2951_v57  ;;  %v2239_v33 = vpop.f32.mrb[21].mxu1 }
0x17cf   :  { %2438 = vtanh.f32 %v1452_v32  ;;  %v2059_v35 = vmul.f32 -1.442695, %v1452_v32 }
0x17d1   :  { %2440 = vpow2.f32 %v2059_v35 }
0x17d9   :  { %v2439_v34 = vpop.eup %2438 }
0x17da   :  { %1462 = vrot.lane.b32.xlu0 %v2439_v34, %s2662_s1  ;;  %v2666_v34 = vmov 1966171168  }
0x17db   :  { %v2441_v36 = vpop.eup %2440  ;;  %v1763_v35 = vunpack.c.l.s4 %v2666_v34 }
0x17dc   :  { %v1456_v26 = vadd.f32 1.0, %v2441_v36  ;;  %v1765_v36 = vlaneseq }
0x17de   :  { %2442 = vrcp.f32 %v1456_v26  ;;  %v1764_v26 = vunpack.c.0.s8 %v1763_v35 }
0x17e2   :  { %v1671_v2 = vpop.f32.mrb[22].mxu1 }
0x17e3   :  { %v2254_v4 = vpop.f32.mrb[23].mxu1 }
0x17e8   :  { %v2443_v37 = vpop.eup %2442 }
0x17e9   :  { %v1460_v57 = vmul.f32 %v2443_v37, %v1354_v51  ;;  %v2335_v51 = vpack.c.bf16 %v1678_v11, %v1677_v10 }
0x184c   :  { %v1463_v38 = vpop.permute.xlu0 %1462 }
0x184d   :  { %v1465_v39 = vmul.f32 %v2443_v37, %v1463_v38 }
0x184f   :  { %1467 = vrot.lane.b32.xlu0 %v1465_v39, %s2663_s23 }
0x18c1   :  { %v1468_v40 = vpop.permute.xlu0 %1467 }
0x18c2   :  { %v1470_v53 = vadd.f32 %v1468_v40, %v1460_v57 }
0x18c4   :  { %2444 = vtanh.f32 %v1470_v53 }
0x18ce   :  { %v2445_v44 = vpop.eup %2444 }
0x18cf   :  { %1473 = vrot.lane.b32.xlu1 %v2445_v44, %s2664_s25 }
0x1941   :  { %v1474_v45 = vpop.permute.xlu1 %1473 }
0x1942   :  { %v1476_v48 = vmul.f32 %v2443_v37, %v1474_v45  ;;  %v1766_v37 = vshrl.u32 %v1765_v36, 7 }
0x1944   :  { %v1483_v54 = vmul.f32 %v1482_v46, %v1476_v48  ;;  %v1479_v56 = vmul.f32 %v1478_v47, %v1476_v48  ;;  %v1491_v61 = vmul.f32 %v1490_v50, %v1476_v48  ;;  %v1487_v62 = vmul.f32 %v1486_v52, %v1476_v48 }
0x1945   :  { %v3101_v38 = vsub.s32 %v1764_v26, %v1766_v37  ;;  %v3104_v42 = vsub.s32 0, %v1766_v37 }
0x1946   :  { %v1484_v58 = vadd.f32 %v1483_v54, %v1368_v22  ;;  %v1480_v60 = vadd.f32 %v1479_v56, %v1364_v23  ;;  %v1492_v63 = vadd.f32 %v1491_v61, %v1376_v24  ;;  %v1488_v0 = vadd.f32 %v1487_v62, %v1372_v25  ;;  %v1687_v23 = vld [vmem:[%s3203_s14 + $0x60] sm:$0xff]  ;;  %v1688_v24 = vld [vmem:[%s3203_s14 + $0x68] sm:$0xff] }
0x1947   :  { %v2347_v22 = vpack.c.bf16 %v1686_v21, %v1685_v20  ;;  %v2350_v25 = vpack.c.bf16 %v1688_v24, %v1687_v23 }
0x1948   :  { %1501 = vrot.lane.b32.xlu1 %v1484_v58, %s2665_s3  ;;  %1499 = vrot.lane.b32.xlu0 %v1480_v60, %s2665_s3 }
0x194c   :  { %1505 = vrot.lane.b32.xlu1 %v1492_v63, %s2665_s3  ;;  %1503 = vrot.lane.b32.xlu0 %v1488_v0, %s2665_s3 }
0x19ba   :  { %v1502_v8 = vpop.permute.xlu1 %1501  ;;  %v1500_v9 = vpop.permute.xlu0 %1499 }
0x19bb   :  { %2244 = vmatprep.mubr.msk.f32.mxu0 %vm435_vm2, %v1500_v9 }
0x19bc   :  { %2245 = vmatmul.mubr.msk.f32.vlgmr.msra.gmra.mrb[8].mxu0 %vm435_vm2, %v1502_v8 }
0x19bd   :  { %2333 = vmatpush3.bf16.msra.mxu0 %v2332_v7 }
0x19be   :  { %v1506_v59 = vpop.permute.xlu1 %1505  ;;  %v1504_v12 = vpop.permute.xlu0 %1503  ;;  %2334 = vmatprep.subr.bf16.mxu0 %v2657_v1 }
0x19bf   :  { %2247 = vmatprep.mubr.msk.f32.mxu0 %vm435_vm2, %v1504_v12 }
0x19c0   :  { %2248 = vmatmul.mubr.msk.f32.gmra.mrb[10].mxu0 %vm435_vm2, %v1506_v59 }
0x19c1   :  { %2336 = vmatpush3.bf16.msra.mxu0 %v2335_v51  ;;  %2287 = vmatprep.mubr.msk.f32.mxu0 %vm2658_vm0, %v2659_v3  ;;  %v1684_v3 = vld [vmem:[%s3203_s14 + $0x48] sm:$0xff]  ;;  %s2667_s14 = smov 112  }
0x19c2   :  { %2337 = vmatprep.subr.bf16.mxu0 %v2657_v1  ;;  %v2344_v19 = vpack.c.bf16 %v1684_v3, %v1683_v18 }
0x19c5   :  { %2339 = vmatpush3.bf16.msra.mxu0 %v2338_v14 }
0x19c6   :  { %2340 = vmatprep.subr.bf16.mxu0 %v2657_v1 }
0x19c9   :  { %2342 = vmatpush3.bf16.msra.mxu0 %v2341_v17 }
0x19ca   :  { %2343 = vmatprep.subr.bf16.mxu0 %v2657_v1 }
0x19cd   :  { %2345 = vmatpush3.bf16.msra.mxu0 %v2344_v19 }
0x19ce   :  { %2346 = vmatprep.subr.bf16.mxu0 %v2657_v1 }
0x19d1   :  { %2348 = vmatpush3.bf16.msra.mxu0 %v2347_v22 }
0x19d2   :  { %2349 = vmatprep.subr.bf16.mxu0 %v2657_v1 }
0x19d5   :  { %2351 = vmatpush3.bf16.msra.mxu0 %v2350_v25 }
0x19d6   :  { %2352 = vmatprep.subr.bf16.mxu0 %v2657_v1 }
0x19d9   :  { %2354 = vmatpush3.bf16.msra.mxu0 %v2353_v29 }
0x19dc   :  { %2288 = vmatmul.mubr.f32.vlgmr.msra.gmra.mrb[12].mxu0 %v1671_v2  ;;  %v2069_v2 = vld.sshfl [vmem:[#allocation15] sm:$0x33 pattern:$0x75316420] }
0x19dd   :  { %v1940_v6 = vcombine.high %v2069_v2, %v2069_v2  ;;  %v1947_v8 = vrot.slane %v2069_v2, %v3101_v38 }
0x19df   :  { %v1954_v10 = vrot.slane %v1940_v6, %v3101_v38  ;;  %v1960_v51 = vrot.slane %v1947_v8, %v3104_v42  ;;  %v1955_v29 = vcombine.high %v1947_v8, %v1947_v8 }
0x19e1   :  { %v1964_v55 = vrot.slane %v1954_v10, %v3104_v42 }
0x1a8f   :  { %v3093_v30 = vpop.f32.mrb[8].mxu0 }
0x1a90   :  { %v3095_v31 = vpop.f32.mrb[9].mxu0 }
0x1a93   :  { %v3097_v32 = vpop.f32.mrb[10].mxu0 }
0x1a94   :  { %v3099_v33 = vpop.f32.mrb[11].mxu0 }
0x1aaf   :  { %v1757_v39 = vpop.f32.mrb[12].mxu0 }
0x1ab0   :  { %v1768_v1 = vrot.slane %v1757_v39, %v3101_v38  ;;  %v2289_v57 = vpop.f32.mrb[13].mxu0 }
0x1ab2   :  { %v1769_v40 = vcombine.high %v1768_v1, %v1768_v1  ;;  %v1776_v53 = vrot.slane %v1768_v1, %v3101_v38 }
0x1ab4   :  { %v1783_v49 = vrot.slane %v1769_v40, %v3101_v38  ;;  %v1784_v41 = vcombine.high %v1776_v53, %v1776_v53  ;;  %1791 = vst.msk [vmem:[#allocation16] sm:$0x1] %vm1790_vm4, %v1776_v53  ;;  %v1798_v43 = vrot.slane %v1776_v53, %v3104_v42 }
0x1ab6   :  { %v1785_v44 = vcombine.high %v1783_v49, %v1783_v49  ;;  %1792 = vst.msk [vmem:[#allocation16 + $0x8] sm:$0x1] %vm1790_vm4, %v1783_v49  ;;  %1793 = vst.msk [vmem:[#allocation16 + $0x10] sm:$0x1] %vm1790_vm4, %v1784_v41  ;;  %v1802_v45 = vrot.slane %v1783_v49, %v3104_v42  ;;  %1811 = vrot.lane.b32.xlu0 %v1798_v43, %s2667_s14  ;;  %v1806_v46 = vrot.slane %v1784_v41, %v3104_v42 }
0x1ab8   :  { %1794 = vst.msk [vmem:[#allocation16 + $0x18] sm:$0x1] %vm1790_vm4, %v1785_v44  ;;  %1813 = vrot.lane.b32.xlu1 %v1802_v45, %s2667_s14  ;;  %v1810_v47 = vrot.slane %v1785_v44, %v3104_v42 }
0x1aba   :  { %1827 = vrot.lane.b32.xlu0 %v1798_v43, %s2662_s1 }
0x1abc   :  { %1829 = vrot.lane.b32.xlu1 %v1802_v45, %s2662_s1 }
0x1abe   :  { %1843 = vrot.lane.b32.xlu0 %v1798_v43, %s2665_s3 }
0x1ac0   :  { %1845 = vrot.lane.b32.xlu1 %v1802_v45, %s2665_s3 }
0x1ac2   :  { %1859 = vrot.lane.b32.xlu0 %v1798_v43, %s2668_s5 }
0x1ac4   :  { %1861 = vrot.lane.b32.xlu1 %v1802_v45, %s2668_s5 }
0x1ac6   :  { %1875 = vrot.lane.b32.xlu0 %v1798_v43, %s2669_s20 }
0x1ac8   :  { %1877 = vrot.lane.b32.xlu1 %v1802_v45, %s2669_s20 }
0x1aca   :  { %1891 = vrot.lane.b32.xlu0 %v1798_v43, %s2664_s25 }
0x1acc   :  { %1893 = vrot.lane.b32.xlu1 %v1802_v45, %s2664_s25 }
0x1ace   :  { %1907 = vrot.lane.b32.xlu0 %v1798_v43, %s2663_s23 }
0x1ad0   :  { %1909 = vrot.lane.b32.xlu1 %v1802_v45, %s2663_s23 }
0x1ad2   :  { %1815 = vrot.lane.b32.xlu0 %v1806_v46, %s2667_s14 }
0x1ad4   :  { %1817 = vrot.lane.b32.xlu1 %v1810_v47, %s2667_s14 }
0x1ad6   :  { %1831 = vrot.lane.b32.xlu0 %v1806_v46, %s2662_s1 }
0x1ad8   :  { %1833 = vrot.lane.b32.xlu1 %v1810_v47, %s2662_s1  ;;  %s2670_s1 = smov [#allocation16]  }
0x1ada   :  { %1847 = vrot.lane.b32.xlu0 %v1806_v46, %s2665_s3 }
0x1adc   :  { %1849 = vrot.lane.b32.xlu1 %v1810_v47, %s2665_s3 }
0x1ade   :  { %1863 = vrot.lane.b32.xlu0 %v1806_v46, %s2668_s5 }
0x1ae0   :  { %1865 = vrot.lane.b32.xlu1 %v1810_v47, %s2668_s5 }
0x1ae2   :  { %1879 = vrot.lane.b32.xlu0 %v1806_v46, %s2669_s20 }
0x1ae4   :  { %1881 = vrot.lane.b32.xlu1 %v1810_v47, %s2669_s20 }
0x1ae6   :  { %1895 = vrot.lane.b32.xlu0 %v1806_v46, %s2664_s25 }
0x1ae8   :  { %1897 = vrot.lane.b32.xlu1 %v1810_v47, %s2664_s25 }
0x1aea   :  { %1911 = vrot.lane.b32.xlu0 %v1806_v46, %s2663_s23 }
0x1aec   :  { %1913 = vrot.lane.b32.xlu1 %v1810_v47, %s2663_s23  ;;  %s1990_s23 = sshll.u32 %s2670_s1, 4  ;;  %s1991_s23 = int_to_ptr.vmem [resolvable:$true] %s1990_s23 }
0x1aed   :  { %s2612_s25 = scalar_lea.vmem %s1991_s23, 512  ;;  %p2617_p6 = scmp.lt.s32.totalorder %s1991_s23, %s1991_s23 }
0x1aee   :  { %p2613_p5 = scmp.ne.s32.totalorder %s1991_s23, %s2612_s25  ;;  %p2618_p7 = scmp.lt.s32.totalorder %s2612_s25, %s2612_s25 }
0x1af0   :  { %p2619_p8 = por %p2618_p7, %p2617_p6 }
0x1af2   :  { %p2620_p9 = pnand %p2619_p8, %p2613_p5 }
0x1b28   :  { %v1812_v48 = vpop.permute.xlu0 %1811 }
0x1b29   :  { %1823 = vst.msk [vmem:[#allocation16 + $0x1] sm:$0x1] %vm1790_vm4, %v1812_v48 }
0x1b2a   :  { %v1814_v50 = vpop.permute.xlu1 %1813 }
0x1b2b   :  { %1824 = vst.msk [vmem:[#allocation16 + $0x9] sm:$0x1] %vm1790_vm4, %v1814_v50 }
0x1b2c   :  { %v1828_v52 = vpop.permute.xlu0 %1827 }
0x1b2d   :  { %1839 = vst.msk [vmem:[#allocation16 + $0x2] sm:$0x1] %vm1790_vm4, %v1828_v52 }
0x1b2e   :  { %v1830_v54 = vpop.permute.xlu1 %1829 }
0x1b2f   :  { %1840 = vst.msk [vmem:[#allocation16 + $0xa] sm:$0x1] %vm1790_vm4, %v1830_v54 }
0x1b30   :  { %v1844_v56 = vpop.permute.xlu0 %1843 }
0x1b31   :  { %1855 = vst.msk [vmem:[#allocation16 + $0x3] sm:$0x1] %vm1790_vm4, %v1844_v56 }
0x1b32   :  { %v1846_v58 = vpop.permute.xlu1 %1845 }
0x1b33   :  { %1856 = vst.msk [vmem:[#allocation16 + $0xb] sm:$0x1] %vm1790_vm4, %v1846_v58 }
0x1b34   :  { %v1860_v60 = vpop.permute.xlu0 %1859 }
0x1b35   :  { %1871 = vst.msk [vmem:[#allocation16 + $0x4] sm:$0x1] %vm1790_vm4, %v1860_v60 }
0x1b36   :  { %v1862_v61 = vpop.permute.xlu1 %1861 }
0x1b37   :  { %1872 = vst.msk [vmem:[#allocation16 + $0xc] sm:$0x1] %vm1790_vm4, %v1862_v61 }
0x1b38   :  { %v1876_v62 = vpop.permute.xlu0 %1875 }
0x1b39   :  { %1887 = vst.msk [vmem:[#allocation16 + $0x5] sm:$0x1] %vm1790_vm4, %v1876_v62 }
0x1b3a   :  { %v1878_v63 = vpop.permute.xlu1 %1877 }
0x1b3b   :  { %1888 = vst.msk [vmem:[#allocation16 + $0xd] sm:$0x1] %vm1790_vm4, %v1878_v63 }
0x1b3c   :  { %v1892_v0 = vpop.permute.xlu0 %1891 }
0x1b3d   :  { %1903 = vst.msk [vmem:[#allocation16 + $0x6] sm:$0x1] %vm1790_vm4, %v1892_v0 }
0x1b3e   :  { %v1894_v4 = vpop.permute.xlu1 %1893 }
0x1b3f   :  { %1904 = vst.msk [vmem:[#allocation16 + $0xe] sm:$0x1] %vm1790_vm4, %v1894_v4 }
0x1b40   :  { %v1908_v5 = vpop.permute.xlu0 %1907 }
0x1b41   :  { %1919 = vst.msk [vmem:[#allocation16 + $0x7] sm:$0x1] %vm1790_vm4, %v1908_v5 }
0x1b42   :  { %v1910_v7 = vpop.permute.xlu1 %1909 }
0x1b43   :  { %1920 = vst.msk [vmem:[#allocation16 + $0xf] sm:$0x1] %vm1790_vm4, %v1910_v7 }
0x1b44   :  { %v1816_v9 = vpop.permute.xlu0 %1815 }
0x1b45   :  { %1825 = vst.msk [vmem:[#allocation16 + $0x11] sm:$0x1] %vm1790_vm4, %v1816_v9 }
0x1b46   :  { %v1818_v11 = vpop.permute.xlu1 %1817 }
0x1b47   :  { %1826 = vst.msk [vmem:[#allocation16 + $0x19] sm:$0x1] %vm1790_vm4, %v1818_v11 }
0x1b48   :  { %v1923_v59 = vld [vmem:[#allocation16] sm:$0xff]  ;;  %v1832_v12 = vpop.permute.xlu0 %1831 }
0x1b49   :  { %v1927_v13 = vadd.f32 %v1923_v59, %v3095_v31  ;;  %1841 = vst.msk [vmem:[#allocation16 + $0x12] sm:$0x1] %vm1790_vm4, %v1832_v12  ;;  %v1968_v31 = vrot.slane %v1955_v29, %v3104_v42 }
0x1b4a   :  { %v1924_v14 = vld [vmem:[#allocation16 + $0x8] sm:$0xff]  ;;  %v1834_v15 = vpop.permute.xlu1 %1833 }
0x1b4b   :  { %v1977_v16 = vadd.f32 %v1960_v51, %v1927_v13  ;;  %v1928_v17 = vadd.f32 %v3093_v30, %v1924_v14  ;;  %1842 = vst.msk [vmem:[#allocation16 + $0x1a] sm:$0x1] %vm1790_vm4, %v1834_v15  ;;  %v1956_v30 = vcombine.high %v1954_v10, %v1954_v10 }
0x1b4c   :  { %v1848_v18 = vpop.permute.xlu0 %1847 }
0x1b4d   :  { %1981 = vst.msk [vmem:[#allocation16] sm:$0xff] %vm435_vm2, %v1977_v16  ;;  %v1978_v3 = vadd.f32 %v1964_v55, %v1928_v17  ;;  %v1972_v35 = vrot.slane %v1956_v30, %v3104_v42 }
0x1b4e   :  { %1857 = vst.msk [vmem:[#allocation16 + $0x13] sm:$0x1] %vm1790_vm4, %v1848_v18  ;;  %v1850_v19 = vpop.permute.xlu1 %1849 }
0x1b4f   :  { %1982 = vst.msk [vmem:[#allocation16 + $0x8] sm:$0xff] %vm435_vm2, %v1978_v3 }
0x1b50   :  { %1858 = vst.msk [vmem:[#allocation16 + $0x1b] sm:$0x1] %vm1790_vm4, %v1850_v19  ;;  %v1864_v20 = vpop.permute.xlu0 %1863 }
0x1b51   :  { %1873 = vst.msk [vmem:[#allocation16 + $0x14] sm:$0x1] %vm1790_vm4, %v1864_v20 }
0x1b52   :  { %v1866_v21 = vpop.permute.xlu1 %1865 }
0x1b53   :  { %1874 = vst.msk [vmem:[#allocation16 + $0x1c] sm:$0x1] %vm1790_vm4, %v1866_v21 }
0x1b54   :  { %v1880_v22 = vpop.permute.xlu0 %1879 }
0x1b55   :  { %1889 = vst.msk [vmem:[#allocation16 + $0x15] sm:$0x1] %vm1790_vm4, %v1880_v22 }
0x1b56   :  { %v1882_v23 = vpop.permute.xlu1 %1881 }
0x1b57   :  { %1890 = vst.msk [vmem:[#allocation16 + $0x1d] sm:$0x1] %vm1790_vm4, %v1882_v23 }
0x1b58   :  { %v1896_v24 = vpop.permute.xlu0 %1895 }
0x1b59   :  { %1905 = vst.msk [vmem:[#allocation16 + $0x16] sm:$0x1] %vm1790_vm4, %v1896_v24 }
0x1b5a   :  { %v1898_v25 = vpop.permute.xlu1 %1897 }
0x1b5b   :  { %1906 = vst.msk [vmem:[#allocation16 + $0x1e] sm:$0x1] %vm1790_vm4, %v1898_v25 }
0x1b5c   :  { %v1912_v27 = vpop.permute.xlu0 %1911 }
0x1b5d   :  { %1921 = vst.msk [vmem:[#allocation16 + $0x17] sm:$0x1] %vm1790_vm4, %v1912_v27 }
0x1b5e   :  { %v1914_v28 = vpop.permute.xlu1 %1913 }
0x1b5f   :  { %1922 = vst.msk [vmem:[#allocation16 + $0x1f] sm:$0x1] %vm1790_vm4, %v1914_v28 }
0x1b64   :  { %v1925_v34 = vld [vmem:[#allocation16 + $0x10] sm:$0xff] }
0x1b65   :  { %v1929_v36 = vadd.f32 %v1925_v34, %v3099_v33 }
0x1b66   :  { %v1926_v26 = vld [vmem:[#allocation16 + $0x18] sm:$0xff] }
0x1b67   :  { %v1979_v37 = vadd.f32 %v1968_v31, %v1929_v36  ;;  %v1930_v38 = vadd.f32 %v3097_v32, %v1926_v26 }
0x1b69   :  { %1983 = vst.msk [vmem:[#allocation16 + $0x10] sm:$0xff] %vm435_vm2, %v1979_v37  ;;  %v1980_v39 = vadd.f32 %v1972_v35, %v1930_v38 }
0x1b6b   :  { %1984 = vst.msk [vmem:[#allocation16 + $0x18] sm:$0xff] %vm435_vm2, %v1980_v39 }
0x1b6c   :  { %2623 = shalt.err (!%p2620_p9)
}
0x1b6d   :  { %s2624_s27 = scalar_lea.hbm %s3205_s16, 512 }
0x1b6e   :  { %p2625_p10 = scmp.ne.s32.totalorder %s3205_s16, %s2624_s27  ;;  %p2628_p11 = scmp.lt.u32.totalorder %s2624_s27, %s3205_s16 }
0x1b70   :  { %p2630_p12 = pnand %p2628_p11, %p2625_p10 }
0x1b72   :  { %2633 = shalt.err (!%p2630_p12)
}
0x1b73   :  { %1996 = dma.vmem_to_hbm [thread:$0]  %s1991_s23, 512, %s3205_s16, [#allocation4], %s2648_s4, %s2648_s4, %s2649_s22  }
0x1b74   :  { %2644 = dma.done.wait [#allocation4], 512  }
0x1b75   :  { %2645 = vsyncadd [#allocation4], 4294966784 }
0x1b76   :  { %2000 = vsyncpa [#allocation3], 1 }
0x1b77   :  { %2001 = vsyncpa [#allocation7], 1 }
0x1b78   :  { %2002 = vsyncpa [#allocation10], 1 }
0x1b79   :  { %2003 = vsyncpa [#allocation14], 1 }
0x1b7a   :  { %2004 = vsyncpa [#allocation4], 1 }
0x1b7b   :  { %2005 = vsyncpa [#allocation5], 1 }

</bundles_post_ra>
